<compile_context>
chip_gen: v7x
topology: tpu7x:2x2x1
jax: 0.10.0
libtpu: 0.0.40
codegen_flags: <defaults>
</compile_context>

<pallas_src>
import math
import functools

import jax
import jax.numpy as jnp
from jax.experimental import pallas as pl
from jax.experimental.pallas import tpu as pltpu

LN_EPS = 1e-5  # PyTorch nn.LayerNorm default


# ----------------------------------------------------------------------------
# Helpers
# ----------------------------------------------------------------------------
def _layernorm(y, gamma, beta):
    mean = jnp.mean(y, axis=-1, keepdims=True)
    var = jnp.mean(jnp.square(y - mean), axis=-1, keepdims=True)
    return (y - mean) * jax.lax.rsqrt(var + LN_EPS) * gamma + beta


def _seq_tile(L, pref=256):
    """Largest sequence tile <= pref that divides L and is a multiple of 8
    (or the full length for small L).  For awkward production lengths prefer
    padding L so a 256-aligned tile exists (v6e/v7x MXU is 256 deep)."""
    if L <= pref:
        return L
    t = (pref // 8) * 8
    while t >= 8:
        if L % t == 0:
            return t
        t -= 8
    return L


def _nbytes(shape, dtype):
    return int(math.prod(shape)) * jnp.dtype(dtype).itemsize


def _compiler_params(dim_sems, block_bytes, scratch_bytes=0):
    # Double-buffered blocks + scratch + headroom, clamped so it also fits
    # v7x's 64 MiB physical VMEM (v5e/v6e have 128 MiB).
    limit = 2 * block_bytes + scratch_bytes + (8 << 20)
    limit = max(16 << 20, min(limit, 64 << 20))
    return pltpu.CompilerParams(dimension_semantics=dim_sems,
                                vmem_limit_bytes=int(limit))


# ----------------------------------------------------------------------------
# Fused Multi-Head-Attention kernel
#   grid = (batch, query-tile, head); head is the innermost reduction axis.
#   Per grid step: Q projection for this head/tile, (cached) K/V projection,
#   scaled-dot-product attention, attn-probability writeback, per-head output
#   projection accumulated into fp32 scratch; residual + bias + LayerNorm at
#   the last head.
# ----------------------------------------------------------------------------
def _mha_kernel(q_ref, kv_ref, mask_ref,
                wq_ref, bq_ref, wk_ref, bk_ref, wv_ref, bv_ref,
                wo_ref, bo_ref, g_ref, beta_ref,
                out_ref, attn_ref,
                kcache, vcache, acc_ref, *, scale):
    t = pl.program_id(1)
    h = pl.program_id(2)
    last_h = pl.num_programs(2) - 1

    # Cache this head's K/V projection once per batch element (first query
    # tile), reuse it for every later query tile -> no KV-proj recompute.
    @pl.when(t == 0)
    def _cache_kv():
        xkv = kv_ref[0].astype(jnp.bfloat16)                       # [Lk, d_model]
        k_h = jnp.dot(xkv, wk_ref[0],
                      preferred_element_type=jnp.float32) + bk_ref[0]
        v_h = jnp.dot(xkv, wv_ref[0],
                      preferred_element_type=jnp.float32) + bv_ref[0]
        kcache[h] = k_h.astype(jnp.bfloat16)                       # [Lk, d_k]
        vcache[h] = v_h.astype(jnp.bfloat16)                       # [Lk, d_v]

    # Fresh fp32 accumulator for this (batch, query-tile).
    @pl.when(h == 0)
    def _init_acc():
        acc_ref[...] = jnp.zeros_like(acc_ref)

    x_q = q_ref[0]                                                 # [TQ, d_model] fp32 (residual)
    xq_b = x_q.astype(jnp.bfloat16)                                # cast once (hoisted)

    # Q projection for this head.
    q_h = jnp.dot(xq_b, wq_ref[0],
                  preferred_element_type=jnp.float32) + bq_ref[0]  # [TQ, d_k]

    k_h = kcache[h]                                                # [Lk, d_k] bf16
    v_h = vcache[h]                                                # [Lk, d_v] bf16

    # scores = q_h @ k_h^T / sqrt(d_k)   (contract over d_k, no transpose)
    scores = jax.lax.dot_general(
        q_h.astype(jnp.bfloat16), k_h, (((1,), (1,)), ((), ())),
        preferred_element_type=jnp.float32) * scale                # [TQ, Lk] fp32
    # masked_fill_(mask, -1e9): large negative keeps softmax NaN-free even if
    # a row were fully masked (degenerates to uniform instead of NaN).
    scores = jnp.where(mask_ref[0] > 0.5, jnp.float32(-1e9), scores)

    # Exact fp32 softmax (attention maps are returned by the module).
    scores = scores - jnp.max(scores, axis=-1, keepdims=True)
    e = jnp.exp(scores)
    attn = e / jnp.sum(e, axis=-1, keepdims=True)

    # Lane-dense per-head attention-probability slab, written once.
    attn_ref[0, 0] = attn.astype(attn_ref.dtype)

    # Per-head context and output-projection contribution (accumulated fp32).
    ctx = jnp.dot(attn.astype(jnp.bfloat16), v_h,
                  preferred_element_type=jnp.float32)              # [TQ, d_v]
    acc_ref[...] += jnp.dot(ctx.astype(jnp.bfloat16), wo_ref[0],
                            preferred_element_type=jnp.float32)    # [TQ, d_model]

    # Epilogue at the last head: bias + residual + LayerNorm.
    @pl.when(h == last_h)
    def _epilogue():
        y = x_q + acc_ref[...] + bo_ref[...]
        out_ref[0] = _layernorm(y, g_ref[...], beta_ref[...]).astype(out_ref.dtype)


def pallas_mha(q_in, kv_in, attn_mask, p, n_heads, d_k, d_v):
    """q_in: [B, Lq, d_model], kv_in: [B, Lk, d_model], mask: [B, Lq, Lk]."""
    B, Lq, d_model = q_in.shape
    Lk = kv_in.shape[1]
    TQ = _seq_tile(Lq)
    nqt = Lq // TQ

    kernel = functools.partial(_mha_kernel, scale=1.0 / math.sqrt(d_k))

    in_specs = [
        pl.BlockSpec((1, TQ, d_model), lambda b, t, h: (b, t, 0)),    # q tile
        pl.BlockSpec((1, Lk, d_model), lambda b, t, h: (b, 0, 0)),    # kv (resident per batch)
        pl.BlockSpec((1, TQ, Lk),      lambda b, t, h: (b, t, 0)),    # mask tile
        pl.BlockSpec((1, d_model, d_k), lambda b, t, h: (h, 0, 0)),   # wq[h]
        pl.BlockSpec((1, 1, d_k),       lambda b, t, h: (h, 0, 0)),   # bq[h]
        pl.BlockSpec((1, d_model, d_k), lambda b, t, h: (h, 0, 0)),   # wk[h]
        pl.BlockSpec((1, 1, d_k),       lambda b, t, h: (h, 0, 0)),   # bk[h]
        pl.BlockSpec((1, d_model, d_v), lambda b, t, h: (h, 0, 0)),   # wv[h]
        pl.BlockSpec((1, 1, d_v),       lambda b, t, h: (h, 0, 0)),   # bv[h]
        pl.BlockSpec((1, d_v, d_model), lambda b, t, h: (h, 0, 0)),   # wo[h]
        pl.BlockSpec((1, d_model),      lambda b, t, h: (0, 0)),      # bo
        pl.BlockSpec((1, d_model),      lambda b, t, h: (0, 0)),      # ln gamma
        pl.BlockSpec((1, d_model),      lambda b, t, h: (0, 0)),      # ln beta
        # TODO(synk): at production d_model on v7x, add pipeline_mode=pl.Buffered(1)
        # to the constant-index weight/bias/LN specs to single-buffer them.
    ]
    out_specs = (
        pl.BlockSpec((1, TQ, d_model), lambda b, t, h: (b, t, 0)),    # layer output (resident over h)
        pl.BlockSpec((1, 1, TQ, Lk),   lambda b, t, h: (b, h, t, 0)), # per-head attn slab
    )
    scratch = [
        pltpu.VMEM((n_heads, Lk, d_k), jnp.bfloat16),   # K-proj cache (all heads of one batch)
        pltpu.VMEM((n_heads, Lk, d_v), jnp.bfloat16),   # V-proj cache
        pltpu.VMEM((TQ, d_model), jnp.float32),         # output-projection accumulator
    ]

    block_bytes = (_nbytes((TQ, d_model), jnp.float32)
                   + _nbytes((Lk, d_model), jnp.float32)
                   + _nbytes((TQ, Lk), jnp.float32)
                   + 2 * _nbytes((d_model, d_k), jnp.bfloat16)
                   + _nbytes((d_model, d_v), jnp.bfloat16)
                   + _nbytes((d_v, d_model), jnp.bfloat16)
                   + 6 * _nbytes((1, d_model), jnp.float32)
                   + _nbytes((TQ, d_model), jnp.float32)
                   + _nbytes((TQ, Lk), jnp.float32))
    scratch_bytes = (_nbytes((n_heads, Lk, d_k), jnp.bfloat16)
                     + _nbytes((n_heads, Lk, d_v), jnp.bfloat16)
                     + _nbytes((TQ, d_model), jnp.float32))

    flops = 2 * B * (Lq * d_model * n_heads * d_k          # Q proj
                     + Lk * d_model * n_heads * d_k        # K proj
                     + Lk * d_model * n_heads * d_v        # V proj
                     + n_heads * Lq * Lk * (d_k + d_v)     # scores + context
                     + Lq * n_heads * d_v * d_model)       # output proj
    bytes_accessed = (2 * _nbytes((B, Lq, d_model), jnp.float32)      # q in + out
                      + _nbytes((B, Lk, d_model), jnp.float32)        # kv
                      + _nbytes((B, Lq, Lk), jnp.float32)             # mask
                      + _nbytes((B, n_heads, Lq, Lk), jnp.float32)    # attn out
                      + 2 * _nbytes((n_heads, d_model, d_k), jnp.bfloat16)
                      + 2 * _nbytes((n_heads, d_model, d_v), jnp.bfloat16))
    cost = pl.CostEstimate(flops=int(flops),
                           transcendentals=int(B * n_heads * Lq * Lk),
                           bytes_accessed=int(bytes_accessed))

    out, attn = pl.pallas_call(
        kernel,
        out_shape=(
            jax.ShapeDtypeStruct((B, Lq, d_model), jnp.float32),
            jax.ShapeDtypeStruct((B, n_heads, Lq, Lk), jnp.float32),
        ),
        grid=(B, nqt, n_heads),
        in_specs=in_specs,
        out_specs=out_specs,
        scratch_shapes=scratch,
        compiler_params=_compiler_params(("parallel", "arbitrary", "arbitrary"),
                                         block_bytes, scratch_bytes),
        cost_estimate=cost,
    )(q_in, kv_in, attn_mask,
      p["wq"], p["bq"], p["wk"], p["bk"], p["wv"], p["bv"],
      p["wo"], p["bo"], p["ln_g"], p["ln_b"])
    return out, attn


# ----------------------------------------------------------------------------
# Fused position-wise FFN kernel (Conv1d(k=1) -> ReLU -> Conv1d(k=1)
#   + residual + LayerNorm), sequence-tiled.
# ----------------------------------------------------------------------------
def _ffn_kernel(x_ref, w1_ref, b1_ref, w2_ref, b2_ref, g_ref, beta_ref, o_ref):
    x = x_ref[0]                                    # [TL, d_model] fp32 (residual)
    xb = x.astype(jnp.bfloat16)
    hid = jnp.dot(xb, w1_ref[...], preferred_element_type=jnp.float32) + b1_ref[...]
    hid = jnp.maximum(hid, 0.0)
    y = jnp.dot(hid.astype(jnp.bfloat16), w2_ref[...],
                preferred_element_type=jnp.float32) + b2_ref[...]
    y = x + y
    o_ref[0] = _layernorm(y, g_ref[...], beta_ref[...]).astype(o_ref.dtype)


def pallas_pos_ffn(x, w1, b1, w2, b2, gamma, beta):
    B, L, d_model = x.shape
    d_ff = w1.shape[1]
    TL = _seq_tile(L)
    nlt = L // TL
    # TODO(synk): for production d_ff (e.g. 4096) on v7x (64 MiB VMEM), add an
    # "arbitrary" grid axis over d_ff chunks with an fp32 VMEM accumulator for
    # the second matmul; unnecessary at these sizes.

    block_bytes = (2 * _nbytes((TL, d_model), jnp.float32)
                   + 2 * _nbytes((d_model, d_ff), jnp.bfloat16)
                   + _nbytes((1, d_ff), jnp.float32)
                   + 3 * _nbytes((1, d_model), jnp.float32))
    cost = pl.CostEstimate(
        flops=int(4 * B * L * d_model * d_ff),
        transcendentals=0,
        bytes_accessed=int(2 * _nbytes((B, L, d_model), jnp.float32)
                           + 2 * _nbytes((d_model, d_ff), jnp.bfloat16)))

    return pl.pallas_call(
        _ffn_kernel,
        out_shape=jax.ShapeDtypeStruct((B, L, d_model), jnp.float32),
        grid=(B, nlt),
        in_specs=[
            pl.BlockSpec((1, TL, d_model), lambda b, t: (b, t, 0)),
            pl.BlockSpec((d_model, d_ff), lambda b, t: (0, 0)),
            pl.BlockSpec((1, d_ff), lambda b, t: (0, 0)),
            pl.BlockSpec((d_ff, d_model), lambda b, t: (0, 0)),
            pl.BlockSpec((1, d_model), lambda b, t: (0, 0)),
            pl.BlockSpec((1, d_model), lambda b, t: (0, 0)),
            pl.BlockSpec((1, d_model), lambda b, t: (0, 0)),
        ],
        out_specs=pl.BlockSpec((1, TL, d_model), lambda b, t: (b, t, 0)),
        compiler_params=_compiler_params(("parallel", "parallel"), block_bytes),
        cost_estimate=cost,
    )(x, w1, b1, w2, b2, gamma, beta)


# ----------------------------------------------------------------------------
# Module-level forward (matches TransformerDecoderLayer.forward)
# ----------------------------------------------------------------------------
def transformer_decoder_layer(dec_inputs, enc_outputs, self_attn_mask,
                              enc_attn_mask, params, n_heads, d_k, d_v):
    dec_out, dec_self_attn = pallas_mha(
        dec_inputs, dec_inputs, self_attn_mask, params["self_attn"],
        n_heads, d_k, d_v)
    dec_out, dec_enc_attn = pallas_mha(
        dec_out, enc_outputs, enc_attn_mask, params["enc_attn"],
        n_heads, d_k, d_v)
    f = params["ffn"]
    dec_out = pallas_pos_ffn(dec_out, f["w1"], f["b1"], f["w2"], f["b2"],
                             f["ln_g"], f["ln_b"])
    return dec_out, dec_self_attn, dec_enc_attn


# ----------------------------------------------------------------------------
# Deterministic parameter init (synthetic, PyTorch-Linear-style uniform).
# Attention weights are stored head-major ([H, d_model, d_k] etc.) so the
# kernel receives full lane-dense per-head blocks via BlockSpec; this is the
# one-time load-time layout transform of the PyTorch [d_model, H*d_k] Linear.
# Weights in bf16 (MXU fast path); biases / LN params in fp32.
# ----------------------------------------------------------------------------
def _init_linear(key, din, dout):
    kw, kb = jax.random.split(key)
    bound = 1.0 / math.sqrt(din)
    w = jax.random.uniform(kw, (din, dout), jnp.float32, -bound, bound)
    b = jax.random.uniform(kb, (dout,), jnp.float32, -bound, bound)
    return w, b


def _init_mha(key, d_k, d_v, d_model, n_heads):
    k1, k2, k3, k4 = jax.random.split(key, 4)
    wq, bq = _init_linear(k1, d_model, n_heads * d_k)
    wk, bk = _init_linear(k2, d_model, n_heads * d_k)
    wv, bv = _init_linear(k3, d_model, n_heads * d_v)
    wo, bo = _init_linear(k4, n_heads * d_v, d_model)

    def head_major(w, d):       # [d_model, H*d] -> [H, d_model, d]
        return jnp.transpose(w.reshape(d_model, n_heads, d), (1, 0, 2)).astype(jnp.bfloat16)

    def head_bias(b, d):        # [H*d] -> [H, 1, d]
        return b.reshape(n_heads, 1, d)

    return dict(
        wq=head_major(wq, d_k), bq=head_bias(bq, d_k),
        wk=head_major(wk, d_k), bk=head_bias(bk, d_k),
        wv=head_major(wv, d_v), bv=head_bias(bv, d_v),
        wo=wo.reshape(n_heads, d_v, d_model).astype(jnp.bfloat16),   # [H, d_v, d_model]
        bo=bo.reshape(1, d_model),
        ln_g=jnp.ones((1, d_model), jnp.float32),
        ln_b=jnp.zeros((1, d_model), jnp.float32))


def _init_ffn(key, d_model, d_ff):
    k1, k2 = jax.random.split(key)
    w1, b1 = _init_linear(k1, d_model, d_ff)   # Conv1d(d_model, d_ff, 1)
    w2, b2 = _init_linear(k2, d_ff, d_model)   # Conv1d(d_ff, d_model, 1)
    return dict(w1=w1.astype(jnp.bfloat16), b1=b1.reshape(1, d_ff),
                w2=w2.astype(jnp.bfloat16), b2=b2.reshape(1, d_model),
                ln_g=jnp.ones((1, d_model), jnp.float32),
                ln_b=jnp.zeros((1, d_model), jnp.float32))


def init_params(key, d_k, d_v, d_model, d_ff, n_heads):
    ks, ke, kf = jax.random.split(key, 3)
    return dict(self_attn=_init_mha(ks, d_k, d_v, d_model, n_heads),
                enc_attn=_init_mha(ke, d_k, d_v, d_model, n_heads),
                ffn=_init_ffn(kf, d_model, d_ff))


# ----------------------------------------------------------------------------
if __name__ == "__main__":
    d_k, d_v, d_model, d_ff, n_heads = 8, 8, 32, 64, 4
    B, L_dec, L_enc = 2, 8, 8

    key = jax.random.PRNGKey(0)
    kp, kd, ke = jax.random.split(key, 3)
    params = init_params(kp, d_k, d_v, d_model, d_ff, n_heads)

    dec_inputs = jax.random.normal(kd, (B, L_dec, d_model), jnp.float32)
    enc_outputs = jax.random.normal(ke, (B, L_enc, d_model), jnp.float32)

    # self-attention mask: causal (1.0 == masked, like torch masked_fill mask)
    causal = jnp.triu(jnp.ones((L_dec, L_dec), jnp.float32), k=1)
    self_attn_mask = jnp.broadcast_to(causal, (B, L_dec, L_dec))
    # encoder attention mask: nothing masked
    enc_attn_mask = jnp.zeros((B, L_dec, L_enc), jnp.float32)

    fwd = jax.jit(functools.partial(transformer_decoder_layer,
                                    n_heads=n_heads, d_k=d_k, d_v=d_v))
    dec_out, self_attn, enc_attn = fwd(dec_inputs, enc_outputs,
                                       self_attn_mask, enc_attn_mask, params)
    jax.block_until_ready((dec_out, self_attn, enc_attn))

    assert dec_out.shape == (B, L_dec, d_model)
    assert self_attn.shape == (B, n_heads, L_dec, L_dec)
    assert enc_attn.shape == (B, n_heads, L_dec, L_enc)
    assert bool(jnp.all(jnp.isfinite(dec_out)))
    # exact softmax -> probabilities sum to 1, causal mask respected
    assert bool(jnp.allclose(jnp.sum(self_attn, axis=-1), 1.0, atol=1e-3))
    assert bool(jnp.allclose(jnp.sum(enc_attn, axis=-1), 1.0, atol=1e-3))
    print("KERNEL_OK")
</pallas_src>

<mosaic_0001>
module attributes {stable_mosaic.version = 11 : i64} {
  func.func @_ffn_kernel(%arg0: i32, %arg1: i32, %arg2: memref<1x8x32xf32, #tpu.memory_space<vmem>>, %arg3: memref<32x64xbf16, #tpu.memory_space<vmem>>, %arg4: memref<1x64xf32, #tpu.memory_space<vmem>>, %arg5: memref<64x32xbf16, #tpu.memory_space<vmem>>, %arg6: memref<1x32xf32, #tpu.memory_space<vmem>>, %arg7: memref<1x32xf32, #tpu.memory_space<vmem>>, %arg8: memref<1x32xf32, #tpu.memory_space<vmem>>, %arg9: memref<1x8x32xf32, #tpu.memory_space<vmem>>) attributes {dimension_semantics = [#tpu.dimension_semantics<parallel>, #tpu.dimension_semantics<parallel>], iteration_bounds = array<i64: 2, 1>, scalar_prefetch = 0 : i64, scratch_operands = 0 : i64, tpu.core_type = #tpu.core_type<tc>, window_params = [{transform_indices = @transform_0, window_bounds = array<i64: 1, 8, 32>}, {pipeline_mode = #tpu.pipeline_mode<synchronous>, transform_indices = @transform_1, window_bounds = array<i64: 32, 64>}, {pipeline_mode = #tpu.pipeline_mode<synchronous>, transform_indices = @transform_2, window_bounds = array<i64: 1, 64>}, {pipeline_mode = #tpu.pipeline_mode<synchronous>, transform_indices = @transform_3, window_bounds = array<i64: 64, 32>}, {pipeline_mode = #tpu.pipeline_mode<synchronous>, transform_indices = @transform_4, window_bounds = array<i64: 1, 32>}, {pipeline_mode = #tpu.pipeline_mode<synchronous>, transform_indices = @transform_5, window_bounds = array<i64: 1, 32>}, {pipeline_mode = #tpu.pipeline_mode<synchronous>, transform_indices = @transform_6, window_bounds = array<i64: 1, 32>}, {transform_indices = @transform_7, window_bounds = array<i64: 1, 8, 32>}]} {
    %c0 = arith.constant 0 : index
    %c0_0 = arith.constant 0 : index
    %c0_1 = arith.constant 0 : index
    %0 = vector.load %arg2[%c0, %c0_0, %c0_1] : memref<1x8x32xf32, #tpu.memory_space<vmem>>, vector<1x8x32xf32>
    %1 = vector.shape_cast %0 : vector<1x8x32xf32> to vector<8x32xf32>
    %2 = arith.truncf %1 : vector<8x32xf32> to vector<8x32xbf16>
    %c0_2 = arith.constant 0 : index
    %c0_3 = arith.constant 0 : index
    %3 = vector.load %arg3[%c0_2, %c0_3] : memref<32x64xbf16, #tpu.memory_space<vmem>>, vector<32x64xbf16>
    %cst = arith.constant dense<0.000000e+00> : vector<8x64xf32>
    %4 = tpu.matmul %2, %3, %cst {dimension_numbers = #tpu.dot_dimension_numbers<[1], [0], [0], [1], [0, 0, 1, 1], [], []>} : vector<8x32xbf16>, vector<32x64xbf16>, vector<8x64xf32> -> vector<8x64xf32>
    %c0_4 = arith.constant 0 : index
    %c0_5 = arith.constant 0 : index
    %5 = vector.load %arg4[%c0_4, %c0_5] : memref<1x64xf32, #tpu.memory_space<vmem>>, vector<1x64xf32>
    %6 = vector.broadcast %5 : vector<1x64xf32> to vector<8x64xf32>
    %7 = arith.addf %4, %6 : vector<8x64xf32>
    %cst_6 = arith.constant 0.000000e+00 : f32
    %8 = vector.broadcast %cst_6 : f32 to vector<8x64xf32>
    %9 = arith.maximumf %7, %8 : vector<8x64xf32>
    %10 = arith.truncf %9 : vector<8x64xf32> to vector<8x64xbf16>
    %c0_7 = arith.constant 0 : index
    %c0_8 = arith.constant 0 : index
    %11 = vector.load %arg5[%c0_7, %c0_8] : memref<64x32xbf16, #tpu.memory_space<vmem>>, vector<64x32xbf16>
    %cst_9 = arith.constant dense<0.000000e+00> : vector<8x32xf32>
    %12 = tpu.matmul %10, %11, %cst_9 {dimension_numbers = #tpu.dot_dimension_numbers<[1], [0], [0], [1], [0, 0, 1, 1], [], []>} : vector<8x64xbf16>, vector<64x32xbf16>, vector<8x32xf32> -> vector<8x32xf32>
    %c0_10 = arith.constant 0 : index
    %c0_11 = arith.constant 0 : index
    %13 = vector.load %arg6[%c0_10, %c0_11] : memref<1x32xf32, #tpu.memory_space<vmem>>, vector<1x32xf32>
    %14 = vector.broadcast %13 : vector<1x32xf32> to vector<8x32xf32>
    %15 = arith.addf %12, %14 : vector<8x32xf32>
    %16 = arith.addf %1, %15 : vector<8x32xf32>
    %c0_12 = arith.constant 0 : index
    %c0_13 = arith.constant 0 : index
    %17 = vector.load %arg7[%c0_12, %c0_13] : memref<1x32xf32, #tpu.memory_space<vmem>>, vector<1x32xf32>
    %c0_14 = arith.constant 0 : index
    %c0_15 = arith.constant 0 : index
    %18 = vector.load %arg8[%c0_14, %c0_15] : memref<1x32xf32, #tpu.memory_space<vmem>>, vector<1x32xf32>
    %cst_16 = arith.constant dense<0.000000e+00> : vector<8xf32>
    %19 = vector.multi_reduction <add>, %16, %cst_16 [1] : vector<8x32xf32> to vector<8xf32>
    %20 = vector.shape_cast %19 : vector<8xf32> to vector<8x1xf32>
    %cst_17 = arith.constant 3.200000e+01 : f32
    %21 = vector.broadcast %cst_17 : f32 to vector<8x1xf32>
    %22 = arith.divf %20, %21 : vector<8x1xf32>
    %23 = vector.broadcast %22 : vector<8x1xf32> to vector<8x32xf32>
    %24 = arith.subf %16, %23 : vector<8x32xf32>
    %25 = arith.mulf %24, %24 : vector<8x32xf32>
    %cst_18 = arith.constant dense<0.000000e+00> : vector<8xf32>
    %26 = vector.multi_reduction <add>, %25, %cst_18 [1] : vector<8x32xf32> to vector<8xf32>
    %27 = vector.shape_cast %26 : vector<8xf32> to vector<8x1xf32>
    %cst_19 = arith.constant 3.200000e+01 : f32
    %28 = vector.broadcast %cst_19 : f32 to vector<8x1xf32>
    %29 = arith.divf %27, %28 : vector<8x1xf32>
    %30 = vector.broadcast %22 : vector<8x1xf32> to vector<8x32xf32>
    %31 = arith.subf %16, %30 : vector<8x32xf32>
    %cst_20 = arith.constant 9.99999974E-6 : f32
    %32 = vector.broadcast %cst_20 : f32 to vector<8x1xf32>
    %33 = arith.addf %29, %32 : vector<8x1xf32>
    %34 = math.rsqrt %33 : vector<8x1xf32>
    %35 = vector.broadcast %34 : vector<8x1xf32> to vector<8x32xf32>
    %36 = arith.mulf %31, %35 : vector<8x32xf32>
    %37 = vector.broadcast %17 : vector<1x32xf32> to vector<8x32xf32>
    %38 = arith.mulf %36, %37 : vector<8x32xf32>
    %39 = vector.broadcast %18 : vector<1x32xf32> to vector<8x32xf32>
    %40 = arith.addf %38, %39 : vector<8x32xf32>
    %c0_21 = arith.constant 0 : index
    %c0_22 = arith.constant 0 : index
    %c0_23 = arith.constant 0 : index
    %41 = vector.load %arg9[%c0_21, %c0_22, %c0_23] : memref<1x8x32xf32, #tpu.memory_space<vmem>>, vector<1x8x32xf32>
    %42 = vector.shape_cast %41 : vector<1x8x32xf32> to vector<8x32xf32>
    %43 = vector.shape_cast %40 : vector<8x32xf32> to vector<1x8x32xf32>
    tpu.vector_store %arg9[%c0_21, %c0_22, %c0_23], %43 {strides = array<i32>} : memref<1x8x32xf32, #tpu.memory_space<vmem>>, vector<1x8x32xf32>,
    return
  }
  func.func @transform_0(%arg0: i32, %arg1: i32) -> (i32, i32, i32) {
    %c0_i32 = arith.constant 0 : i32
    %c0_i32_0 = arith.constant 0 : i32
    return %arg0, %arg1, %c0_i32 : i32, i32, i32
  }
  func.func @transform_1(%arg0: i32, %arg1: i32) -> (i32, i32) {
    %c0_i32 = arith.constant 0 : i32
    %c0_i32_0 = arith.constant 0 : i32
    %c0_i32_1 = arith.constant 0 : i32
    return %c0_i32, %c0_i32_0 : i32, i32
  }
  func.func @transform_2(%arg0: i32, %arg1: i32) -> (i32, i32) {
    %c0_i32 = arith.constant 0 : i32
    %c0_i32_0 = arith.constant 0 : i32
    %c0_i32_1 = arith.constant 0 : i32
    return %c0_i32, %c0_i32_0 : i32, i32
  }
  func.func @transform_3(%arg0: i32, %arg1: i32) -> (i32, i32) {
    %c0_i32 = arith.constant 0 : i32
    %c0_i32_0 = arith.constant 0 : i32
    %c0_i32_1 = arith.constant 0 : i32
    return %c0_i32, %c0_i32_0 : i32, i32
  }
  func.func @transform_4(%arg0: i32, %arg1: i32) -> (i32, i32) {
    %c0_i32 = arith.constant 0 : i32
    %c0_i32_0 = arith.constant 0 : i32
    %c0_i32_1 = arith.constant 0 : i32
    return %c0_i32, %c0_i32_0 : i32, i32
  }
  func.func @transform_5(%arg0: i32, %arg1: i32) -> (i32, i32) {
    %c0_i32 = arith.constant 0 : i32
    %c0_i32_0 = arith.constant 0 : i32
    %c0_i32_1 = arith.constant 0 : i32
    return %c0_i32, %c0_i32_0 : i32, i32
  }
  func.func @transform_6(%arg0: i32, %arg1: i32) -> (i32, i32) {
    %c0_i32 = arith.constant 0 : i32
    %c0_i32_0 = arith.constant 0 : i32
    %c0_i32_1 = arith.constant 0 : i32
    return %c0_i32, %c0_i32_0 : i32, i32
  }
  func.func @transform_7(%arg0: i32, %arg1: i32) -> (i32, i32, i32) {
    %c0_i32 = arith.constant 0 : i32
    %c0_i32_0 = arith.constant 0 : i32
    return %arg0, %arg1, %c0_i32 : i32, i32, i32
  }
}

module attributes {stable_mosaic.version = 11 : i64} {
  func.func @_mha_kernel(%arg0: i32, %arg1: i32, %arg2: i32, %arg3: memref<1x8x32xf32, #tpu.memory_space<vmem>>, %arg4: memref<1x8x32xf32, #tpu.memory_space<vmem>>, %arg5: memref<1x8x8xf32, #tpu.memory_space<vmem>>, %arg6: memref<1x32x8xbf16, #tpu.memory_space<vmem>>, %arg7: memref<1x1x8xf32, #tpu.memory_space<vmem>>, %arg8: memref<1x32x8xbf16, #tpu.memory_space<vmem>>, %arg9: memref<1x1x8xf32, #tpu.memory_space<vmem>>, %arg10: memref<1x32x8xbf16, #tpu.memory_space<vmem>>, %arg11: memref<1x1x8xf32, #tpu.memory_space<vmem>>, %arg12: memref<1x8x32xbf16, #tpu.memory_space<vmem>>, %arg13: memref<1x32xf32, #tpu.memory_space<vmem>>, %arg14: memref<1x32xf32, #tpu.memory_space<vmem>>, %arg15: memref<1x32xf32, #tpu.memory_space<vmem>>, %arg16: memref<1x8x32xf32, #tpu.memory_space<vmem>>, %arg17: memref<1x1x8x8xf32, #tpu.memory_space<vmem>>, %arg18: memref<4x8x8xbf16, #tpu.memory_space<vmem>>, %arg19: memref<4x8x8xbf16, #tpu.memory_space<vmem>>, %arg20: memref<8x32xf32, #tpu.memory_space<vmem>>) attributes {dimension_semantics = [#tpu.dimension_semantics<parallel>, #tpu.dimension_semantics<arbitrary>, #tpu.dimension_semantics<arbitrary>], iteration_bounds = array<i64: 2, 1, 4>, scalar_prefetch = 0 : i64, scratch_operands = 3 : i64, tpu.core_type = #tpu.core_type<tc>, window_params = [{transform_indices = @transform_0, window_bounds = array<i64: 1, 8, 32>}, {transform_indices = @transform_1, window_bounds = array<i64: 1, 8, 32>}, {transform_indices = @transform_2, window_bounds = array<i64: 1, 8, 8>}, {transform_indices = @transform_3, window_bounds = array<i64: 1, 32, 8>}, {transform_indices = @transform_4, window_bounds = array<i64: 1, 1, 8>}, {transform_indices = @transform_5, window_bounds = array<i64: 1, 32, 8>}, {transform_indices = @transform_6, window_bounds = array<i64: 1, 1, 8>}, {transform_indices = @transform_7, window_bounds = array<i64: 1, 32, 8>}, {transform_indices = @transform_8, window_bounds = array<i64: 1, 1, 8>}, {transform_indices = @transform_9, window_bounds = array<i64: 1, 8, 32>}, {pipeline_mode = #tpu.pipeline_mode<synchronous>, transform_indices = @transform_10, window_bounds = array<i64: 1, 32>}, {pipeline_mode = #tpu.pipeline_mode<synchronous>, transform_indices = @transform_11, window_bounds = array<i64: 1, 32>}, {pipeline_mode = #tpu.pipeline_mode<synchronous>, transform_indices = @transform_12, window_bounds = array<i64: 1, 32>}, {transform_indices = @transform_13, window_bounds = array<i64: 1, 8, 32>}, {transform_indices = @transform_14, window_bounds = array<i64: 1, 1, 8, 8>}]} {
    %c0_i32 = arith.constant 0 : i32
    %0 = arith.cmpi eq, %arg1, %c0_i32 : i32
    %1 = arith.extui %0 : i1 to i32
    %c0_i32_0 = arith.constant 0 : i32
    %2 = arith.cmpi ne, %1, %c0_i32_0 : i32
    scf.if %2 {
      %c0_38 = arith.constant 0 : index
      %c0_39 = arith.constant 0 : index
      %c0_40 = arith.constant 0 : index
      %56 = vector.load %arg4[%c0_38, %c0_39, %c0_40] : memref<1x8x32xf32, #tpu.memory_space<vmem>>, vector<1x8x32xf32>
      %57 = vector.shape_cast %56 : vector<1x8x32xf32> to vector<8x32xf32>
      %58 = arith.truncf %57 : vector<8x32xf32> to vector<8x32xbf16>
      %c0_41 = arith.constant 0 : index
      %c0_42 = arith.constant 0 : index
      %c0_43 = arith.constant 0 : index
      %59 = vector.load %arg8[%c0_41, %c0_42, %c0_43] : memref<1x32x8xbf16, #tpu.memory_space<vmem>>, vector<1x32x8xbf16>
      %60 = vector.shape_cast %59 : vector<1x32x8xbf16> to vector<32x8xbf16>
      %cst_44 = arith.constant dense<0.000000e+00> : vector<8x8xf32>
      %61 = tpu.matmul %58, %60, %cst_44 {dimension_numbers = #tpu.dot_dimension_numbers<[1], [0], [0], [1], [0, 0, 1, 1], [], []>} : vector<8x32xbf16>, vector<32x8xbf16>, vector<8x8xf32> -> vector<8x8xf32>
      %c0_45 = arith.constant 0 : index
      %c0_46 = arith.constant 0 : index
      %c0_47 = arith.constant 0 : index
      %62 = vector.load %arg9[%c0_45, %c0_46, %c0_47] : memref<1x1x8xf32, #tpu.memory_space<vmem>>, vector<1x1x8xf32>
      %63 = vector.shape_cast %62 : vector<1x1x8xf32> to vector<1x8xf32>
      %64 = vector.broadcast %63 : vector<1x8xf32> to vector<8x8xf32>
      %65 = arith.addf %61, %64 : vector<8x8xf32>
      %c0_48 = arith.constant 0 : index
      %c0_49 = arith.constant 0 : index
      %c0_50 = arith.constant 0 : index
      %66 = vector.load %arg10[%c0_48, %c0_49, %c0_50] : memref<1x32x8xbf16, #tpu.memory_space<vmem>>, vector<1x32x8xbf16>
      %67 = vector.shape_cast %66 : vector<1x32x8xbf16> to vector<32x8xbf16>
      %cst_51 = arith.constant dense<0.000000e+00> : vector<8x8xf32>
      %68 = tpu.matmul %58, %67, %cst_51 {dimension_numbers = #tpu.dot_dimension_numbers<[1], [0], [0], [1], [0, 0, 1, 1], [], []>} : vector<8x32xbf16>, vector<32x8xbf16>, vector<8x8xf32> -> vector<8x8xf32>
      %c0_52 = arith.constant 0 : index
      %c0_53 = arith.constant 0 : index
      %c0_54 = arith.constant 0 : index
      %69 = vector.load %arg11[%c0_52, %c0_53, %c0_54] : memref<1x1x8xf32, #tpu.memory_space<vmem>>, vector<1x1x8xf32>
      %70 = vector.shape_cast %69 : vector<1x1x8xf32> to vector<1x8xf32>
      %71 = vector.broadcast %70 : vector<1x8xf32> to vector<8x8xf32>
      %72 = arith.addf %68, %71 : vector<8x8xf32>
      %73 = arith.truncf %65 : vector<8x8xf32> to vector<8x8xbf16>
      %74 = arith.index_cast %arg2 : i32 to index
      %c0_55 = arith.constant 0 : index
      %c0_56 = arith.constant 0 : index
      %75 = vector.load %arg18[%74, %c0_55, %c0_56] : memref<4x8x8xbf16, #tpu.memory_space<vmem>>, vector<1x8x8xbf16>
      %76 = vector.shape_cast %75 : vector<1x8x8xbf16> to vector<8x8xbf16>
      %77 = vector.shape_cast %73 : vector<8x8xbf16> to vector<1x8x8xbf16>
      tpu.vector_store %arg18[%74, %c0_55, %c0_56], %77 {strides = array<i32>} : memref<4x8x8xbf16, #tpu.memory_space<vmem>>, vector<1x8x8xbf16>,
      %78 = arith.truncf %72 : vector<8x8xf32> to vector<8x8xbf16>
      %79 = arith.index_cast %arg2 : i32 to index
      %c0_57 = arith.constant 0 : index
      %c0_58 = arith.constant 0 : index
      %80 = vector.load %arg19[%79, %c0_57, %c0_58] : memref<4x8x8xbf16, #tpu.memory_space<vmem>>, vector<1x8x8xbf16>
      %81 = vector.shape_cast %80 : vector<1x8x8xbf16> to vector<8x8xbf16>
      %82 = vector.shape_cast %78 : vector<8x8xbf16> to vector<1x8x8xbf16>
      tpu.vector_store %arg19[%79, %c0_57, %c0_58], %82 {strides = array<i32>} : memref<4x8x8xbf16, #tpu.memory_space<vmem>>, vector<1x8x8xbf16>,
    } else {
    }
    %c0_i32_1 = arith.constant 0 : i32
    %3 = arith.cmpi eq, %arg2, %c0_i32_1 : i32
    %4 = arith.extui %3 : i1 to i32
    %c0_i32_2 = arith.constant 0 : i32
    %5 = arith.cmpi ne, %4, %c0_i32_2 : i32
    scf.if %5 {
      %cst_38 = arith.constant 0.000000e+00 : f32
      %56 = vector.broadcast %cst_38 : f32 to vector<8x32xf32>
      %c0_39 = arith.constant 0 : index
      %c0_40 = arith.constant 0 : index
      %57 = vector.load %arg20[%c0_39, %c0_40] : memref<8x32xf32, #tpu.memory_space<vmem>>, vector<8x32xf32>
      tpu.vector_store %arg20[%c0_39, %c0_40], %56 {strides = array<i32>} : memref<8x32xf32, #tpu.memory_space<vmem>>, vector<8x32xf32>,
    } else {
    }
    %c0 = arith.constant 0 : index
    %c0_3 = arith.constant 0 : index
    %c0_4 = arith.constant 0 : index
    %6 = vector.load %arg3[%c0, %c0_3, %c0_4] : memref<1x8x32xf32, #tpu.memory_space<vmem>>, vector<1x8x32xf32>
    %7 = vector.shape_cast %6 : vector<1x8x32xf32> to vector<8x32xf32>
    %8 = arith.truncf %7 : vector<8x32xf32> to vector<8x32xbf16>
    %c0_5 = arith.constant 0 : index
    %c0_6 = arith.constant 0 : index
    %c0_7 = arith.constant 0 : index
    %9 = vector.load %arg6[%c0_5, %c0_6, %c0_7] : memref<1x32x8xbf16, #tpu.memory_space<vmem>>, vector<1x32x8xbf16>
    %10 = vector.shape_cast %9 : vector<1x32x8xbf16> to vector<32x8xbf16>
    %cst = arith.constant dense<0.000000e+00> : vector<8x8xf32>
    %11 = tpu.matmul %8, %10, %cst {dimension_numbers = #tpu.dot_dimension_numbers<[1], [0], [0], [1], [0, 0, 1, 1], [], []>} : vector<8x32xbf16>, vector<32x8xbf16>, vector<8x8xf32> -> vector<8x8xf32>
    %c0_8 = arith.constant 0 : index
    %c0_9 = arith.constant 0 : index
    %c0_10 = arith.constant 0 : index
    %12 = vector.load %arg7[%c0_8, %c0_9, %c0_10] : memref<1x1x8xf32, #tpu.memory_space<vmem>>, vector<1x1x8xf32>
    %13 = vector.shape_cast %12 : vector<1x1x8xf32> to vector<1x8xf32>
    %14 = vector.broadcast %13 : vector<1x8xf32> to vector<8x8xf32>
    %15 = arith.addf %11, %14 : vector<8x8xf32>
    %16 = arith.index_cast %arg2 : i32 to index
    %c0_11 = arith.constant 0 : index
    %c0_12 = arith.constant 0 : index
    %17 = vector.load %arg18[%16, %c0_11, %c0_12] : memref<4x8x8xbf16, #tpu.memory_space<vmem>>, vector<1x8x8xbf16>
    %18 = vector.shape_cast %17 : vector<1x8x8xbf16> to vector<8x8xbf16>
    %19 = arith.index_cast %arg2 : i32 to index
    %c0_13 = arith.constant 0 : index
    %c0_14 = arith.constant 0 : index
    %20 = vector.load %arg19[%19, %c0_13, %c0_14] : memref<4x8x8xbf16, #tpu.memory_space<vmem>>, vector<1x8x8xbf16>
    %21 = vector.shape_cast %20 : vector<1x8x8xbf16> to vector<8x8xbf16>
    %22 = arith.truncf %15 : vector<8x8xf32> to vector<8x8xbf16>
    %cst_15 = arith.constant dense<0.000000e+00> : vector<8x8xf32>
    %23 = tpu.matmul %22, %18, %cst_15 {dimension_numbers = #tpu.dot_dimension_numbers<[1], [1], [0], [0], [0, 0, 1, 0], [], []>} : vector<8x8xbf16>, vector<8x8xbf16>, vector<8x8xf32> -> vector<8x8xf32>
    %cst_16 = arith.constant 0.353553385 : f32
    %24 = vector.broadcast %cst_16 : f32 to vector<8x8xf32>
    %25 = arith.mulf %23, %24 : vector<8x8xf32>
    %c0_17 = arith.constant 0 : index
    %c0_18 = arith.constant 0 : index
    %c0_19 = arith.constant 0 : index
    %26 = vector.load %arg5[%c0_17, %c0_18, %c0_19] : memref<1x8x8xf32, #tpu.memory_space<vmem>>, vector<1x8x8xf32>
    %27 = vector.shape_cast %26 : vector<1x8x8xf32> to vector<8x8xf32>
    %cst_20 = arith.constant 5.000000e-01 : f32
    %28 = vector.broadcast %cst_20 : f32 to vector<8x8xf32>
    %29 = arith.cmpf ogt, %27, %28 : vector<8x8xf32>
    %cst_21 = arith.constant -1.000000e+09 : f32
    %30 = vector.broadcast %cst_21 : f32 to vector<8x8xf32>
    %31 = arith.select %29, %30, %25 : vector<8x8xi1>, vector<8x8xf32>
    %cst_22 = arith.constant dense<0xFF800000> : vector<8xf32>
    %32 = vector.multi_reduction <maximumf>, %31, %cst_22 [1] : vector<8x8xf32> to vector<8xf32>
    %33 = vector.shape_cast %32 : vector<8xf32> to vector<8x1xf32>
    %34 = vector.broadcast %33 : vector<8x1xf32> to vector<8x8xf32>
    %35 = arith.subf %31, %34 : vector<8x8xf32>
    %36 = math.exp %35 : vector<8x8xf32>
    %cst_23 = arith.constant dense<0.000000e+00> : vector<8xf32>
    %37 = vector.multi_reduction <add>, %36, %cst_23 [1] : vector<8x8xf32> to vector<8xf32>
    %38 = vector.shape_cast %37 : vector<8xf32> to vector<8x1xf32>
    %39 = vector.broadcast %38 : vector<8x1xf32> to vector<8x8xf32>
    %40 = arith.divf %36, %39 : vector<8x8xf32>
    %c0_24 = arith.constant 0 : index
    %c0_25 = arith.constant 0 : index
    %c0_26 = arith.constant 0 : index
    %c0_27 = arith.constant 0 : index
    %41 = vector.load %arg17[%c0_24, %c0_25, %c0_26, %c0_27] : memref<1x1x8x8xf32, #tpu.memory_space<vmem>>, vector<1x1x8x8xf32>
    %42 = vector.shape_cast %41 : vector<1x1x8x8xf32> to vector<8x8xf32>
    %43 = vector.shape_cast %40 : vector<8x8xf32> to vector<1x1x8x8xf32>
    tpu.vector_store %arg17[%c0_24, %c0_25, %c0_26, %c0_27], %43 {strides = array<i32>} : memref<1x1x8x8xf32, #tpu.memory_space<vmem>>, vector<1x1x8x8xf32>,
    %44 = arith.truncf %40 : vector<8x8xf32> to vector<8x8xbf16>
    %cst_28 = arith.constant dense<0.000000e+00> : vector<8x8xf32>
    %45 = tpu.matmul %44, %21, %cst_28 {dimension_numbers = #tpu.dot_dimension_numbers<[1], [0], [0], [1], [0, 0, 1, 1], [], []>} : vector<8x8xbf16>, vector<8x8xbf16>, vector<8x8xf32> -> vector<8x8xf32>
    %c0_29 = arith.constant 0 : index
    %c0_30 = arith.constant 0 : index
    %46 = vector.load %arg20[%c0_29, %c0_30] : memref<8x32xf32, #tpu.memory_space<vmem>>, vector<8x32xf32>
    %47 = arith.truncf %45 : vector<8x8xf32> to vector<8x8xbf16>
    %c0_31 = arith.constant 0 : index
    %c0_32 = arith.constant 0 : index
    %c0_33 = arith.constant 0 : index
    %48 = vector.load %arg12[%c0_31, %c0_32, %c0_33] : memref<1x8x32xbf16, #tpu.memory_space<vmem>>, vector<1x8x32xbf16>
    %49 = vector.shape_cast %48 : vector<1x8x32xbf16> to vector<8x32xbf16>
    %cst_34 = arith.constant dense<0.000000e+00> : vector<8x32xf32>
    %50 = tpu.matmul %47, %49, %cst_34 {dimension_numbers = #tpu.dot_dimension_numbers<[1], [0], [0], [1], [0, 0, 1, 1], [], []>} : vector<8x8xbf16>, vector<8x32xbf16>, vector<8x32xf32> -> vector<8x32xf32>
    %51 = arith.addf %46, %50 : vector<8x32xf32>
    %c0_35 = arith.constant 0 : index
    %c0_36 = arith.constant 0 : index
    %52 = vector.load %arg20[%c0_35, %c0_36] : memref<8x32xf32, #tpu.memory_space<vmem>>, vector<8x32xf32>
    tpu.vector_store %arg20[%c0_35, %c0_36], %51 {strides = array<i32>} : memref<8x32xf32, #tpu.memory_space<vmem>>, vector<8x32xf32>,
    %c3_i32 = arith.constant 3 : i32
    %53 = arith.cmpi eq, %arg2, %c3_i32 : i32
    %54 = arith.extui %53 : i1 to i32
    %c0_i32_37 = arith.constant 0 : i32
    %55 = arith.cmpi ne, %54, %c0_i32_37 : i32
    scf.if %55 {
      %c0_38 = arith.constant 0 : index
      %c0_39 = arith.constant 0 : index
      %56 = vector.load %arg20[%c0_38, %c0_39] : memref<8x32xf32, #tpu.memory_space<vmem>>, vector<8x32xf32>
      %57 = arith.addf %7, %56 : vector<8x32xf32>
      %c0_40 = arith.constant 0 : index
      %c0_41 = arith.constant 0 : index
      %58 = vector.load %arg13[%c0_40, %c0_41] : memref<1x32xf32, #tpu.memory_space<vmem>>, vector<1x32xf32>
      %59 = vector.broadcast %58 : vector<1x32xf32> to vector<8x32xf32>
      %60 = arith.addf %57, %59 : vector<8x32xf32>
      %c0_42 = arith.constant 0 : index
      %c0_43 = arith.constant 0 : index
      %61 = vector.load %arg14[%c0_42, %c0_43] : memref<1x32xf32, #tpu.memory_space<vmem>>, vector<1x32xf32>
      %c0_44 = arith.constant 0 : index
      %c0_45 = arith.constant 0 : index
      %62 = vector.load %arg15[%c0_44, %c0_45] : memref<1x32xf32, #tpu.memory_space<vmem>>, vector<1x32xf32>
      %cst_46 = arith.constant dense<0.000000e+00> : vector<8xf32>
      %63 = vector.multi_reduction <add>, %60, %cst_46 [1] : vector<8x32xf32> to vector<8xf32>
      %64 = vector.shape_cast %63 : vector<8xf32> to vector<8x1xf32>
      %cst_47 = arith.constant 3.200000e+01 : f32
      %65 = vector.broadcast %cst_47 : f32 to vector<8x1xf32>
      %66 = arith.divf %64, %65 : vector<8x1xf32>
      %67 = vector.broadcast %66 : vector<8x1xf32> to vector<8x32xf32>
      %68 = arith.subf %60, %67 : vector<8x32xf32>
      %69 = arith.mulf %68, %68 : vector<8x32xf32>
      %cst_48 = arith.constant dense<0.000000e+00> : vector<8xf32>
      %70 = vector.multi_reduction <add>, %69, %cst_48 [1] : vector<8x32xf32> to vector<8xf32>
      %71 = vector.shape_cast %70 : vector<8xf32> to vector<8x1xf32>
      %cst_49 = arith.constant 3.200000e+01 : f32
      %72 = vector.broadcast %cst_49 : f32 to vector<8x1xf32>
      %73 = arith.divf %71, %72 : vector<8x1xf32>
      %74 = vector.broadcast %66 : vector<8x1xf32> to vector<8x32xf32>
      %75 = arith.subf %60, %74 : vector<8x32xf32>
      %cst_50 = arith.constant 9.99999974E-6 : f32
      %76 = vector.broadcast %cst_50 : f32 to vector<8x1xf32>
      %77 = arith.addf %73, %76 : vector<8x1xf32>
      %78 = math.rsqrt %77 : vector<8x1xf32>
      %79 = vector.broadcast %78 : vector<8x1xf32> to vector<8x32xf32>
      %80 = arith.mulf %75, %79 : vector<8x32xf32>
      %81 = vector.broadcast %61 : vector<1x32xf32> to vector<8x32xf32>
      %82 = arith.mulf %80, %81 : vector<8x32xf32>
      %83 = vector.broadcast %62 : vector<1x32xf32> to vector<8x32xf32>
      %84 = arith.addf %82, %83 : vector<8x32xf32>
      %c0_51 = arith.constant 0 : index
      %c0_52 = arith.constant 0 : index
      %c0_53 = arith.constant 0 : index
      %85 = vector.load %arg16[%c0_51, %c0_52, %c0_53] : memref<1x8x32xf32, #tpu.memory_space<vmem>>, vector<1x8x32xf32>
      %86 = vector.shape_cast %85 : vector<1x8x32xf32> to vector<8x32xf32>
      %87 = vector.shape_cast %84 : vector<8x32xf32> to vector<1x8x32xf32>
      tpu.vector_store %arg16[%c0_51, %c0_52, %c0_53], %87 {strides = array<i32>} : memref<1x8x32xf32, #tpu.memory_space<vmem>>, vector<1x8x32xf32>,
    } else {
    }
    return
  }
  func.func @transform_0(%arg0: i32, %arg1: i32, %arg2: i32) -> (i32, i32, i32) {
    %c0_i32 = arith.constant 0 : i32
    %c0_i32_0 = arith.constant 0 : i32
    return %arg0, %arg1, %c0_i32 : i32, i32, i32
  }
  func.func @transform_1(%arg0: i32, %arg1: i32, %arg2: i32) -> (i32, i32, i32) {
    %c0_i32 = arith.constant 0 : i32
    %c0_i32_0 = arith.constant 0 : i32
    %c0_i32_1 = arith.constant 0 : i32
    return %arg0, %c0_i32, %c0_i32_0 : i32, i32, i32
  }
  func.func @transform_2(%arg0: i32, %arg1: i32, %arg2: i32) -> (i32, i32, i32) {
    %c0_i32 = arith.constant 0 : i32
    %c0_i32_0 = arith.constant 0 : i32
    return %arg0, %arg1, %c0_i32 : i32, i32, i32
  }
  func.func @transform_3(%arg0: i32, %arg1: i32, %arg2: i32) -> (i32, i32, i32) {
    %c0_i32 = arith.constant 0 : i32
    %c0_i32_0 = arith.constant 0 : i32
    %c0_i32_1 = arith.constant 0 : i32
    return %arg2, %c0_i32, %c0_i32_0 : i32, i32, i32
  }
  func.func @transform_4(%arg0: i32, %arg1: i32, %arg2: i32) -> (i32, i32, i32) {
    %c0_i32 = arith.constant 0 : i32
    %c0_i32_0 = arith.constant 0 : i32
    %c0_i32_1 = arith.constant 0 : i32
    return %arg2, %c0_i32, %c0_i32_0 : i32, i32, i32
  }
  func.func @transform_5(%arg0: i32, %arg1: i32, %arg2: i32) -> (i32, i32, i32) {
    %c0_i32 = arith.constant 0 : i32
    %c0_i32_0 = arith.constant 0 : i32
    %c0_i32_1 = arith.constant 0 : i32
    return %arg2, %c0_i32, %c0_i32_0 : i32, i32, i32
  }
  func.func @transform_6(%arg0: i32, %arg1: i32, %arg2: i32) -> (i32, i32, i32) {
    %c0_i32 = arith.constant 0 : i32
    %c0_i32_0 = arith.constant 0 : i32
    %c0_i32_1 = arith.constant 0 : i32
    return %arg2, %c0_i32, %c0_i32_0 : i32, i32, i32
  }
  func.func @transform_7(%arg0: i32, %arg1: i32, %arg2: i32) -> (i32, i32, i32) {
    %c0_i32 = arith.constant 0 : i32
    %c0_i32_0 = arith.constant 0 : i32
    %c0_i32_1 = arith.constant 0 : i32
    return %arg2, %c0_i32, %c0_i32_0 : i32, i32, i32
  }
  func.func @transform_8(%arg0: i32, %arg1: i32, %arg2: i32) -> (i32, i32, i32) {
    %c0_i32 = arith.constant 0 : i32
    %c0_i32_0 = arith.constant 0 : i32
    %c0_i32_1 = arith.constant 0 : i32
    return %arg2, %c0_i32, %c0_i32_0 : i32, i32, i32
  }
  func.func @transform_9(%arg0: i32, %arg1: i32, %arg2: i32) -> (i32, i32, i32) {
    %c0_i32 = arith.constant 0 : i32
    %c0_i32_0 = arith.constant 0 : i32
    %c0_i32_1 = arith.constant 0 : i32
    return %arg2, %c0_i32, %c0_i32_0 : i32, i32, i32
  }
  func.func @transform_10(%arg0: i32, %arg1: i32, %arg2: i32) -> (i32, i32) {
    %c0_i32 = arith.constant 0 : i32
    %c0_i32_0 = arith.constant 0 : i32
    %c0_i32_1 = arith.constant 0 : i32
    return %c0_i32, %c0_i32_0 : i32, i32
  }
  func.func @transform_11(%arg0: i32, %arg1: i32, %arg2: i32) -> (i32, i32) {
    %c0_i32 = arith.constant 0 : i32
    %c0_i32_0 = arith.constant 0 : i32
    %c0_i32_1 = arith.constant 0 : i32
    return %c0_i32, %c0_i32_0 : i32, i32
  }
  func.func @transform_12(%arg0: i32, %arg1: i32, %arg2: i32) -> (i32, i32) {
    %c0_i32 = arith.constant 0 : i32
    %c0_i32_0 = arith.constant 0 : i32
    %c0_i32_1 = arith.constant 0 : i32
    return %c0_i32, %c0_i32_0 : i32, i32
  }
  func.func @transform_13(%arg0: i32, %arg1: i32, %arg2: i32) -> (i32, i32, i32) {
    %c0_i32 = arith.constant 0 : i32
    %c0_i32_0 = arith.constant 0 : i32
    return %arg0, %arg1, %c0_i32 : i32, i32, i32
  }
  func.func @transform_14(%arg0: i32, %arg1: i32, %arg2: i32) -> (i32, i32, i32, i32) {
    %c0_i32 = arith.constant 0 : i32
    %c0_i32_0 = arith.constant 0 : i32
    return %arg0, %arg2, %arg1, %c0_i32 : i32, i32, i32, i32
  }
}

</mosaic_0001>

<bundles_post_ra>
// kernel: transformer_decoder_layer.5
= control target key start
LH: loop header
LB: loop body
LE: loop exit
PB: predicated region body
PF: predicated region fallthrough
CT: control target
= control target key end

     0   :  { %12 = vsyncpa [#allocation3], 0  ;;  %s957_s0 = inlined_call_operand.vmem [shape: f32[2,8,32], index: 0, kind: input, shape index: {}]   ;;  %s958_s1 = inlined_call_operand.vmem [shape: bf16[32,64], index: 1, kind: input, shape index: {}]   ;;  %s959_s2 = inlined_call_operand.vmem [shape: f32[1,64], index: 2, kind: input, shape index: {}]   ;;  %s960_s3 = inlined_call_operand.vmem [shape: bf16[64,32], index: 3, kind: input, shape index: {}]   ;;  %s961_s4 = inlined_call_operand.vmem [shape: f32[1,32], index: 4, kind: input, shape index: {}]   ;;  %s962_s5 = inlined_call_operand.vmem [shape: f32[1,32], index: 5, kind: input, shape index: {}]   ;;  %s963_s6 = inlined_call_operand.vmem [shape: f32[1,32], index: 6, kind: input, shape index: {}]   ;;  %s964_s7 = inlined_call_operand.hbm [shape: f32[2,8,32], index: 7, kind: output, shape index: {}]  }
   0x1   :  { %14 = vsyncpa [#allocation3 + $0x1], 0  ;;  %s811_s24 = smov 0   ;;  %s813_s25 = smov 0  }
   0x2   :  { %s815_s26 = smov 0   ;;  %s817_s27 = smov 0  }
   0x3   :  { %s819_s28 = smov 0   ;;  %s821_s29 = smov 0  }
   0x4 LB: > { %s572_s30 = sadd.s32 4294967295, %s766_s29   ;;  %s573_s8 = sadd.s32 4294967294, %s766_s29   ;;  %s766_s29 = sphi %s821_s29, %s20_s29   ;;  %s762_s28 = sphi %s819_s28, %s971_s28   ;;  %s758_s27 = sphi %s817_s27, %s970_s27   ;;  %s754_s26 = sphi %s815_s26, %s969_s26   ;;  %s750_s25 = sphi %s813_s25, %s968_s25   ;;  %s746_s24 = sphi %s811_s24, %s967_s24  }
   0x5   : > { %s32_s9 = sadd.s32 1, %s762_s28  ;;  %s195_s10 = sadd.s32 1, %s754_s26 }
   0x6   : > { %p34_p0 = scmp.ge.s32.totalorder %s32_s9, 2  ;;  %p205_p1 = scmp.ne.s32.totalorder %s754_s26, %s750_s25 }
   0x7   : > { %p206_p2 = scmp.eq.s32.totalorder %s572_s30, 1  ;;  %p211_p3 = scmp.ne.s32.totalorder %s750_s25, %s746_s24 }
   0x8   : > { %s973_s9 = smov (%p34_p0, %s32_s9), 0  ;;  %p212_p5 = scmp.eq.s32.totalorder %s573_s8, 1 }
   0x9   : > { %p851_p4 = por %p206_p2, %p205_p1  ;;  %s190_s12 = ssub.s32 %s762_s28, %s973_s9 }
   0xa   : > { %p576_p6 = scmp.ge.s32.totalorder %s766_s29, 1  ;;  %p193_p7 = scmp.eq.s32.totalorder %s190_s12, 0 }
   0xb   : > { %p858_p8 = por %p212_p5, %p211_p3  ;;  %p258_p9 = scmp.lt.s32.totalorder %s766_s29, 3 }
   0xc   : > { %s864_s14 = scalar_select %p193_p7, %s754_s26, %s195_s10  }
   0xd   : > { %p259_p10 = pnand %p576_p6, %p258_p9 }
   0xe   : > { %v680_v0 = vld [vmem:[%s958_s1] sm:$0xff] (!%p259_p10)   ;;  %v768_v1 = vmov (!%p259_p10), 0.0   ;;  %v681_v2 = vld [vmem:[%s958_s1 + $0x8] sm:$0xff] (!%p259_p10)   ;;  %vm769_vm0 = vmmov (!%p259_p10), 0   ;;  %p292_p11 = scmp.lt.s32.totalorder (!%p259_p10), %s758_s27, 1  ;;  %vm325_vm1 = vcmask (!%p259_p10), 261120  }
   0xf   : > { %262 = sbr.rel (%p259_p10) target bundleno = 790 (0x316), region = 48  ;;  %603 = vmatprep.subr.bf16.mxu0 (!%p259_p10), %v768_v1  ;;  %611 = vmatprep.subr.bf16.mxu1 (!%p259_p10), %v768_v1  ;;  %v682_v3 = vld [vmem:[%s960_s3] sm:$0xff] (!%p259_p10)   ;;  %v683_v4 = vld [vmem:[%s960_s3 + $0x8] sm:$0xff] (!%p259_p10)   ;;  %v684_v7 = vld [vmem:[%s960_s3 + $0x10] sm:$0xff] (!%p259_p10)   ;;  %vm410_vm2 = vcmask (!%p259_p10), 523264   ;;  %s289_s23 = sand.u32 (!%p259_p10), 1, %s750_s25  }
  0x10   : > { %604 = vmatpush3.bf16.msra.mxu0 (!%p259_p10), %v680_v0  ;;  %607 = vmatprep.mubr.msk.bf16.mxu0 (!%p259_p10), %vm769_vm0, %v768_v1  ;;  %v685_v8 = vld [vmem:[%s960_s3 + $0x18] sm:$0xff] (!%p259_p10)   ;;  %v579_v9 = vld [vmem:[%s959_s2] ss:$0 sm:$0xff] (!%p259_p10)  ;;  %s592_s16 = sshll.u32 (!%p259_p10), %s758_s27, 7  ;;  %s487_s22 = scalar_lea.sflag (!%p259_p10), [#allocation3], %s289_s23 }
  0x11   : > { %605 = vmatprep.subr.bf16.mxu0 (!%p259_p10), %v768_v1  ;;  %619 = vmatprep.mubr.msk.bf16.mxu1 (!%p259_p10), %vm769_vm0, %v768_v1  ;;  %v583_v17 = vld [vmem:[%s961_s4] ss:$0 sm:$0xff] (!%p259_p10) }
  0x12   : > { %612 = vmatpush3.bf16.msra.mxu1 (!%p259_p10), %v682_v3  ;;  %v589_v34 = vld [vmem:[%s962_s5] ss:$0 sm:$0xff] (!%p259_p10) }
  0x13   : > { %613 = vmatprep.subr.bf16.mxu1 (!%p259_p10), %v768_v1  ;;  %v590_v36 = vld [vmem:[%s963_s6] ss:$0 sm:$0xff] (!%p259_p10) }
  0x14   : > { %606 = vmatpush3.bf16.msra.mxu0 (!%p259_p10), %v681_v2 }
  0x16   : > { %s293_s21 = scalar_select %p292_p11, %s758_s27, 1  ;;  %614 = vmatpush3.bf16.msra.mxu1 %v683_v4 }
  0x17   : > { %615 = vmatprep.subr.bf16.mxu1 %v768_v1  ;;  %s770_s27 = smov [#allocation2]  }
  0x18   : > { %s578_s30 = sshll.u32 %s293_s21, 3  ;;  %s909_s21 = scalar_lea.hbm %s964_s7, %s592_s16 }
  0x19   : > { %s298_s12 = scalar_lea.vmem %s957_s0, %s578_s30  ;;  %s577_s30 = sshll.u32 %s289_s23, 3 }
  0x1a   : > { %v300_v5 = vld [vmem:[%s298_s12] sm:$0xff]  ;;  %616 = vmatpush3.bf16.msra.mxu1 %v684_v7  ;;  %s291_s17 = scalar_lea.vmem [#allocation2], %s577_s30  ;;  %s692_s30 = sshll.u32 %s770_s27, 4  ;;  %s693_s30 = int_to_ptr.vmem [resolvable:$false] %s692_s30 }
  0x1b   : > { %v301_v6 = vpack.c.bf16 %v300_v5, %v300_v5  ;;  %617 = vmatprep.subr.bf16.mxu1 %v768_v1  ;;  %s501_s18 = sshll.u32 %s291_s17, 4  ;;  %s694_s10 = scalar_lea.vmem %s693_s30, 256  ;;  %s911_s18 = int_to_ptr.vmem [resolvable:$true] %s501_s18 }
  0x1c   : > { %s688_s8 = scalar_lea.vmem %s911_s18, 128  ;;  %p695_p1 = scmp.lt.s32.totalorder %s911_s18, %s693_s30 }
  0x1d   : > { %608 = vmatmul.mubr.msk.bf16.vlgmr.msra.gmra.mrb[0].mxu0 %vm325_vm1, %v301_v6  ;;  %p689_p12 = scmp.ne.s32.totalorder %s911_s18, %s688_s8  ;;  %p696_p2 = scmp.lt.s32.totalorder %s694_s10, %s688_s8 }
  0x1e   : > { %618 = vmatpush3.bf16.msra.mxu1 %v685_v8 }
  0x1f   : > { %p690_p13 = pnand %p689_p12, %p851_p4  ;;  %p697_p3 = por %p696_p2, %p695_p1 }
  0x21   : > { %p691_p0 = pneg %p690_p13 }
  0x23   : > { %p698_p5 = pnand %p697_p3, %p691_p0 }
  0xf0   : > { %v363_v10 = vpop.f32.mrb[0].mxu0 }
  0xf1   : > { %v364_v11 = vadd.f32 %v579_v9, %v363_v10  ;;  %v609_v12 = vpop.f32.mrb[1].mxu0 }
  0xf2   : > { %v366_v13 = vpop.f32.mrb[2].mxu0 }
  0xf3   : > { %v369_v14 = vmax.f32 %v364_v11, 0.0  ;;  %v610_v15 = vpop.f32.mrb[3].mxu0 }
  0xf5   : > { %v370_v16 = vpack.c.bf16 %v369_v14, %v369_v14 }
  0xf7   : > { %620 = vmatmul.mubr.msk.bf16.vlgmr.msra.gmra.mrb[0].mxu1 %vm410_vm2, %v370_v16 }
 0x1ca   : > { %v448_v18 = vpop.f32.mrb[0].mxu1 }
 0x1cb   : > { %v449_v19 = vadd.f32 %v583_v17, %v448_v18  ;;  %v621_v20 = vpop.f32.mrb[1].mxu1 }
 0x1cc   : > { %v451_v21 = vpop.f32.mrb[2].mxu1 }
 0x1cd   : > { %v622_v22 = vpop.f32.mrb[3].mxu1  ;;  %v454_v23 = vadd.f32 %v449_v19, %v300_v5 }
 0x1cf   : > { %v457_v24 = vsel %vm325_vm1, %v454_v23, 0.0 }
 0x1d0   : > { %458 = vadd.xlane.f32.xlu0 %v457_v24 }
 0x25d   : > { %v459_v25 = vpop.xlane.xlu0 %458 }
 0x25e   : > { %v461_v26 = vmul.f32 0.03125, %v459_v25 }
 0x260   : > { %v462_v27 = vsub.f32 %v454_v23, %v461_v26 }
 0x262   : > { %v463_v28 = vmul.f32 %v462_v27, %v462_v27 }
 0x264   : > { %v464_v29 = vsel %vm325_vm1, %v463_v28, 0.0 }
 0x265   : > { %465 = vadd.xlane.f32.xlu0 %v464_v29 }
 0x2f2   : > { %v466_v30 = vpop.xlane.xlu0 %465 }
 0x2f3   : > { %v467_v31 = vmul.f32 0.03125, %v466_v30 }
 0x2f5   : > { %v468_v32 = vadd.f32 1e-05, %v467_v31 }
 0x2f7   : > { %686 = vrsqrt.f32 %v468_v32 }
 0x301   : > { %v687_v33 = vpop.eup %686 }
 0x302   : > { %v470_v35 = vmul.f32 %v687_v33, %v462_v27 }
 0x304   : > { %v477_v37 = vmul.f32 %v589_v34, %v470_v35 }
 0x306   : > { %v484_v38 = vadd.f32 %v590_v36, %v477_v37 }
 0x308   : > { %485 = vst.msk [vmem:[%s291_s17] sm:$0xff] %vm325_vm1, %v484_v38 }
 0x309   : > { %701 = shalt.err (!%p698_p5)
}
 0x30a   : > { %s702_s23 = scalar_lea.hbm %s909_s21, 128  ;;  %s706_s16 = scalar_lea.hbm %s964_s7, 256 }
 0x30b   : > { %p703_p6 = scmp.ne.s32.totalorder %s909_s21, %s702_s23  ;;  %p707_p10 = scmp.lt.u32.totalorder %s909_s21, %s964_s7 }
 0x30c   : > { %p708_p11 = scmp.lt.u32.totalorder %s706_s16, %s702_s23  ;;  %p710_p13 = scmp.lt.u32.totalorder %s702_s23, %s909_s21 }
 0x30d   : > { %p704_p7 = pnand %p703_p6, %p851_p4 }
 0x30e   : > { %p709_p12 = por %p708_p11, %p707_p10 }
 0x30f   : > { %p705_p9 = pneg %p704_p7 }
 0x310   : > { %p711_p0 = por %p710_p13, %p709_p12 }
 0x312   : > { %p712_p1 = pnand %p711_p0, %p705_p9 }
 0x314   : > { %715 = shalt.err (!%p712_p1)
}
 0x315   : > { %623 = dma.vmem_to_hbm [thread:$0]  (%p851_p4), %s911_s18, 128, %s909_s21, %s487_s22  }
 0x316 PF: > { %p629_p2 = scmp.ge.s32.totalorder %s766_s29, 2  ;;  %s513_s20 = sand.u32 1, %s746_s24  }
 0x317   : > { %s514_s8 = scalar_lea.sflag [#allocation3], %s513_s20 }
 0x318   : > { %p626_p3 = pnand %p629_p2, %p858_p8 }
 0x31a   : > { %741 = dma.done.wait (!%p626_p3), %s514_s8, 128  }
 0x31b   : > { %743 = vsyncadd (!%p626_p3), %s514_s8, 4294967168  ;;  %s20_s29 = sadd.s32 1, %s766_s29   ;;  %s967_s24 = smov %s750_s25 }
 0x31c   : > { %p17_p5 = scmp.ge.s32.totalorder %s20_s29, 4   ;;  %s968_s25 = smov %s754_s26 }
 0x31d   : > { %s969_s26 = smov %s864_s14  ;;  %s970_s27 = smov %s762_s28 }
 0x31e   : > { %s971_s28 = smov %s973_s9  ;;  %19 = sbr.rel (!%p17_p5) target bundleno = 4 (0x4), region = 83 }
 0x325   :  { %519 = vsyncpa [#allocation3], 1 }
 0x326   :  { %521 = vsyncpa [#allocation3 + $0x1], 1 }

// kernel: transformer_decoder_layer.3
= control target key start
LH: loop header
LB: loop body
LE: loop exit
PB: predicated region body
PF: predicated region fallthrough
CT: control target
= control target key end

     0   :  { %s1997_s0 = inlined_call_operand.vmem [shape: f32[2,8,32], index: 0, kind: input, shape index: {}, may-alias: {0,1}]   ;;  %s1998_s1 = inlined_call_operand.vmem [shape: f32[2,8,32], index: 1, kind: input, shape index: {}, may-alias: {0,1}]   ;;  %s1999_s2 = inlined_call_operand.vmem [shape: f32[2,8,8], index: 2, kind: input, shape index: {}]   ;;  %s2000_s3 = inlined_call_operand.vmem [shape: bf16[4,32,8], index: 3, kind: input, shape index: {}]   ;;  %s2001_s4 = inlined_call_operand.vmem [shape: f32[4,1,8], index: 4, kind: input, shape index: {}]   ;;  %s2002_s5 = inlined_call_operand.vmem [shape: bf16[4,32,8], index: 5, kind: input, shape index: {}]   ;;  %s2003_s6 = inlined_call_operand.vmem [shape: f32[4,1,8], index: 6, kind: input, shape index: {}]   ;;  %s2004_s7 = inlined_call_operand.vmem [shape: bf16[4,32,8], index: 7, kind: input, shape index: {}]   ;;  %s2005_s8 = inlined_call_operand.vmem [shape: f32[4,1,8], index: 8, kind: input, shape index: {}]   ;;  %s2006_s9 = inlined_call_operand.vmem [shape: bf16[4,8,32], index: 9, kind: input, shape index: {}]   ;;  %s2007_s10 = inlined_call_operand.vmem [shape: f32[1,32], index: 10, kind: input, shape index: {}]   ;;  %s2008_s11 = inlined_call_operand.vmem [shape: f32[1,32], index: 11, kind: input, shape index: {}]   ;;  %s2009_s12 = inlined_call_operand.vmem [shape: f32[1,32], index: 12, kind: input, shape index: {}]   ;;  %s2010_s13 = inlined_call_operand.vmem [shape: f32[2,8,32], index: 13, kind: output, shape index: {0}]   ;;  %s2011_s14 = inlined_call_operand.hbm [shape: f32[2,4,8,8], index: 14, kind: output, shape index: {1}]  }
   0x1   :  { %2027 = sst [smem:[#allocation20_spill]] %s2007_s10 }
   0x2   :  { %2028 = sst [smem:[#allocation21_spill]] %s2008_s11 }
   0x3   :  { %2029 = sst [smem:[#allocation22_spill]] %s2009_s12 }
   0x4   :  { %2030 = sst [smem:[#allocation23_spill]] %s2011_s14 }
   0x5   :  { %20 = vsyncpa [#allocation6], 0 }
   0x6   :  { %22 = vsyncpa [#allocation6 + $0x1], 0  ;;  %s1729_s29 = smov 0   ;;  %s1731_s30 = smov 0  }
   0x7   :  { %s1733_s15 = smov 0   ;;  %s1735_s16 = smov 0  }
   0x8   :  { %s1737_s17 = smov 0   ;;  %s1739_s18 = smov 0  }
   0x9   :  { %s1741_s19 = smov 0   ;;  %s1743_s20 = smov 0  }
   0xa LB: > { %2031 = sst [smem:[#allocation8_spill]] %s1620_s29  ;;  %s1362_s21 = sadd.s32 4294967295, %s1648_s20   ;;  %s1648_s20 = sphi %s1743_s20, %s28_s20   ;;  %s1644_s19 = sphi %s1741_s19, %s2062_s19   ;;  %s1640_s18 = sphi %s1739_s18, %s2061_s18   ;;  %s1636_s17 = sphi %s1737_s17, %s2060_s17   ;;  %s1632_s16 = sphi %s1735_s16, %s2059_s16   ;;  %s1628_s15 = sphi %s1733_s15, %s2058_s15   ;;  %s1624_s30 = sphi %s1731_s30, %s2057_s30   ;;  %s1620_s29 = sphi %s1729_s29, %s2056_s29  }
   0xb   : > { %2032 = sst [smem:[#allocation9_spill]] %s1624_s30  ;;  %s1363_s22 = sadd.s32 4294967294, %s1648_s20  }
   0xc   : > { %2033 = sst [smem:[#allocation10_spill]] %s1628_s15  ;;  %s40_s23 = sadd.s32 1, %s1640_s18 }
   0xd   : > { %2034 = sst [smem:[#allocation11_spill]] %s1636_s17  ;;  %p41_p0 = scmp.ge.s32.totalorder %s40_s23, 4 }
   0xe   : > { %2035 = sst [smem:[#allocation12_spill]] %s1640_s18  ;;  %s47_s24 = sadd.s32 1, %s1644_s19 }
   0xf   : > { %2036 = sst [smem:[#allocation13_spill]] %s1644_s19  ;;  %p423_p1 = scmp.ne.s32.totalorder %s1628_s15, %s1624_s30 }
  0x10   : > { %2037 = sst [smem:[#allocation14_spill]] %s1648_s20  ;;  %p424_p2 = scmp.eq.s32.totalorder %s1362_s21, 7 }
  0x11   : > { %s2064_s23 = smov (%p41_p0, %s40_s23), 0  ;;  %s2066_s24 = smov (!%p41_p0, %s47_s24), %s1644_s19 }
  0x12   : > { %2038 = sst [smem:[#allocation15_spill]] %s2064_s23  ;;  %s407_s25 = ssub.s32 %s1640_s18, %s2064_s23 }
  0x13   : > { %p1780_p3 = por %p424_p2, %p423_p1  ;;  %p49_p4 = scmp.ge.s32.totalorder %s2066_s24, 2 }
  0x14   : > { %p429_p5 = scmp.ne.s32.totalorder %s1624_s30, %s1620_s29  ;;  %p430_p6 = scmp.eq.s32.totalorder %s1363_s22, 7 }
  0x15   : > { %s2039_s26 = scalar_select %p1780_p3, 1, 0 }
  0x16   : > { %p1366_p7 = scmp.ge.s32.totalorder %s1648_s20, 1  ;;  %s2068_s24 = smov (%p49_p4, %s2066_s24), 0 }
  0x17   : > { %2040 = sst [smem:[#allocation16_spill]] %s2039_s26  ;;  %p1789_p8 = por %p430_p6, %p429_p5 }
  0x18   : > { %2041 = sst [smem:[#allocation17_spill]] %s2068_s24  ;;  %p533_p9 = scmp.lt.s32.totalorder %s1648_s20, 9 }
  0x19   : > { %s2042_s27 = scalar_select %p1789_p8, 1, 0 }
  0x1a   : > { %s406_s28 = ssub.s32 %s1644_s19, %s2068_s24  ;;  %s413_s21 = sadd.s32 1, %s1628_s15 }
  0x1b   : > { %2043 = sst [smem:[#allocation18_spill]] %s2042_s27  ;;  %s408_s14 = sor.u32 %s407_s25, %s406_s28 }
  0x1c   : > { %p534_p10 = pnand %p1366_p7, %p533_p9  ;;  %p411_p11 = scmp.eq.s32.totalorder %s408_s14, 0 }
  0x1d   : > { %s2015_s22 = sand.u32 (!%p534_p10), 1, %s1624_s30   ;;  %p645_p12 = scmp.lt.s32.totalorder (!%p534_p10), %s1632_s16, 3  ;;  %v1650_v0 = vmov (!%p534_p10), 0.0   ;;  %vm1651_vm0 = vmmov (!%p534_p10), 0   ;;  %vm710_vm1 = vcmask (!%p534_p10), 261120   ;;  %vm820_vm2 = vcmask (!%p534_p10), 60416  }
  0x1e   : > { %s1798_s23 = scalar_select %p411_p11, %s1628_s15, %s413_s21  }
  0x1f   : > { %537 = sbr.rel (%p534_p10) target bundleno = 1810 (0x712), region = 72  ;;  %s1804_s18 = sshll.u32 (!%p534_p10), %s2015_s22, 3  ;;  %1426 = vmatprep.subr.bf16.mxu0 (!%p534_p10), %v1650_v0  ;;  %1434 = vmatprep.subr.bf16.mxu1 (!%p534_p10), %v1650_v0 }
  0x20   : > { %2044 = sst [smem:[#allocation19_spill]] %s1798_s23  ;;  %p627_p13 = scmp.lt.s32.totalorder (!%p534_p10), %s1636_s17, 1  ;;  %1430 = vmatprep.mubr.msk.bf16.mxu0 (!%p534_p10), %vm1651_vm0, %v1650_v0  ;;  %1438 = vmatprep.mubr.msk.bf16.mxu1 (!%p534_p10), %vm1651_vm0, %v1650_v0 }
  0x21   : > { %p1389_p0 = scmp.ne.s32.totalorder (!%p534_p10), %s1632_s16, 0 }
  0x26   : > { %s1814_s14 = scalar_select %p645_p12, %s1632_s16, 3 }
  0x27   : > { %s628_s25 = scalar_select %p627_p13, %s1636_s17, 1 }
  0x28   : > { %s1408_s28 = sshll.u32 %s1814_s14, 4  ;;  %s652_s24 = scalar_lea.vmem %s2001_s4, %s1814_s14  ;;  %v1652_v21 = vmov (!%p1389_p0), 0.0  }
  0x29   : > { %s1825_s15 = scalar_lea.vmem %s2000_s3, %s1408_s28  ;;  %s657_s20 = scalar_lea.vmem %s2002_s5, %s1408_s28  ;;  %831 = vst.msk [vmem:[#allocation4] sm:$0xff] (!%p1389_p0), %vm710_vm1, %v1652_v21 }
  0x2a   : > { %s1377_s26 = sshll.u32 %s1814_s14, 2  ;;  %v1542_v1 = vld [vmem:[%s657_s20] sm:$0xff]   ;;  %s665_s17 = scalar_lea.vmem %s2004_s7, %s1408_s28  ;;  %v1544_v3 = vld [vmem:[%s657_s20 + $0x8] sm:$0xff]  }
  0x2b   : > { %s1837_s22 = scalar_lea.vmem %s2006_s9, %s1377_s26  ;;  %v1543_v2 = vld [vmem:[%s665_s17] sm:$0xff]   ;;  %s1839_s21 = sshll.u32 %s628_s25, 3  ;;  %1427 = vmatpush3.bf16.msra.mxu0 %v1542_v1  ;;  %v1545_v4 = vld [vmem:[%s665_s17 + $0x8] sm:$0xff]  }
  0x2c   : > { %s633_s12 = scalar_lea.vmem %s1997_s0, %s1839_s21  ;;  %s637_s10 = scalar_lea.vmem %s1998_s1, %s1839_s21  ;;  %1435 = vmatpush3.bf16.msra.mxu1 %v1543_v2  ;;  %1428 = vmatprep.subr.bf16.mxu0 %v1650_v0 }
  0x2d   : > { %s644_s27 = scalar_lea.vmem %s1999_s2, %s1839_s21  ;;  %s679_s28 = scalar_lea.vmem %s2010_s13, %s1839_s21  ;;  %1436 = vmatprep.subr.bf16.mxu1 %v1650_v0  ;;  %v685_v5 = vld [vmem:[%s637_s10] sm:$0xff] }
  0x2e   : > { %v686_v6 = vpack.c.bf16 %v685_v5, %v685_v5  ;;  %s660_s19 = scalar_lea.vmem %s2003_s6, %s1814_s14  ;;  %s668_s11 = scalar_lea.vmem %s2005_s8, %s1814_s14 }
  0x2f   : > { %1429 = vmatpush3.bf16.msra.mxu0 %v1544_v3  ;;  %v1379_v7 = vld [vmem:[%s660_s19] ss:$0 sm:$0xff]  ;;  %s1387_s26 = sshll.u32 %s1632_s16, 2  ;;  %s626_s25 = scalar_lea.vmem [#allocation5], %s1804_s18 }
  0x30   : > { %1437 = vmatpush3.bf16.msra.mxu1 %v1545_v4  ;;  %v1383_v8 = vld [vmem:[%s668_s11] ss:$0 sm:$0xff]  ;;  %s819_s10 = scalar_lea.vmem [#allocation2], %s1387_s26  ;;  %s1870_s20 = scalar_lea.vmem [#allocation3], %s1387_s26 }
  0x32   : > { %1431 = vmatmul.mubr.msk.bf16.vlgmr.msra.gmra.mrb[0].mxu0 %vm710_vm1, %v686_v6 }
  0x33   : > { %1439 = vmatmul.mubr.msk.bf16.vlgmr.msra.gmra.mrb[0].mxu1 %vm710_vm1, %v686_v6 }
 0x105   : > { %v748_v9 = vpop.f32.mrb[0].mxu0  ;;  %829 = sbr.rel (%p1389_p0) target bundleno = 268 (0x10c), region = 80 }
 0x106   : > { %v749_v10 = vadd.f32 %v1379_v7, %v748_v9  ;;  %v811_v11 = vpop.f32.mrb[0].mxu1  ;;  %v1432_v12 = vpop.f32.mrb[1].mxu0 }
 0x107   : > { %v812_v13 = vadd.f32 %v1383_v8, %v811_v11  ;;  %v1440_v14 = vpop.f32.mrb[1].mxu1  ;;  %v751_v15 = vpop.f32.mrb[2].mxu0 }
 0x108   : > { %v817_v16 = vpack.c.bf16 %v749_v10, %v749_v10  ;;  %v814_v17 = vpop.f32.mrb[2].mxu1  ;;  %v1433_v18 = vpop.f32.mrb[3].mxu0 }
 0x109   : > { %v822_v19 = vpack.c.bf16 %v812_v13, %v812_v13  ;;  %v1441_v20 = vpop.f32.mrb[3].mxu1 }
 0x10a   : > { %821 = vst.msk [vmem:[%s819_s10] sm:$0xf] %vm820_vm2, %v817_v16 }
 0x10b   : > { %825 = vst.msk [vmem:[%s1870_s20] sm:$0xf] %vm820_vm2, %v822_v19 }
 0x10c PF: > { %1442 = vmatprep.subr.bf16.mxu0 %v1650_v0  ;;  %v1546_v22 = vld [vmem:[%s1825_s15] sm:$0xff]   ;;  %1446 = vmatprep.mubr.msk.bf16.mxu0 %vm1651_vm0, %v1650_v0  ;;  %vm908_vm3 = vcmask 64512   ;;  %v1547_v23 = vld [vmem:[%s1825_s15 + $0x8] sm:$0xff]   ;;  %vm975_vm5 = vcmask 1043456   ;;  %p1399_p1 = scmp.ne.s32.totalorder %s1632_s16, 3 }
 0x10d   : > { %1450 = vmatprep.subr.bf16.mxu1 %v1650_v0  ;;  %1452 = vmatprep.mubr.msk.bf16.mxu1 %vm1651_vm0, %v1650_v0  ;;  %v1889_v24 = vld [vmem:[%s633_s12] sm:$0xff]  ;;  %s2046_s11 = sld [smem:[#allocation21_spill]] (!%p1399_p1) }
 0x10e   : > { %1443 = vmatpush3.bf16.msra.mxu0 %v1546_v22  ;;  %v833_v27 = vpack.c.bf16 %v1889_v24, %v1889_v24  ;;  %v1390_v28 = vld [vmem:[%s652_s24] ss:$0 sm:$0xff] }
 0x10f   : > { %1444 = vmatprep.subr.bf16.mxu0 %v1650_v0  ;;  %v956_v35 = vld [vmem:[%s644_s27] sm:$0xff] }
 0x110   : > { %vm957_vm4 = vcmp.gt.f32.partialorder %v956_v35, 0.5  ;;  %v1021_v50 = vld [vmem:[%s1837_s22] sm:$0xf]  ;;  %s2045_s22 = sld [smem:[#allocation20_spill]] (!%p1399_p1) }
 0x111   : > { %v903_v25 = vld [vmem:[%s819_s10] sm:$0xf]  ;;  %v1026_v51 = vsel %vm975_vm5, %v1021_v50, 0 }
 0x112   : > { %v913_v26 = vsel %vm908_vm3, %v903_v25, 0  ;;  %1445 = vmatpush3.bf16.msra.mxu0 %v1547_v23  ;;  %v906_v48 = vld [vmem:[%s1870_s20] sm:$0xf]  ;;  %s2047_s20 = sld [smem:[#allocation22_spill]] (!%p1399_p1) }
 0x113   : > { %1451 = vmatpush3.bf16.xpose.msra.mxu1 %v913_v26  ;;  %1456 = vmatprep.subr.bf16.mxu0 %v1650_v0  ;;  %v977_v49 = vsel %vm975_vm5, %v906_v48, 0  ;;  %v1019_v61 = vld [vmem:[#allocation4] sm:$0xff] }
 0x114   : > { %1462 = vmatprep.subr.bf16.mxu1 %v1650_v0  ;;  %v1401_v17 = vld [vmem:[%s2046_s11] ss:$0 sm:$0xff] (!%p1399_p1) }
 0x115   : > { %1447 = vmatmul.mubr.msk.bf16.vlgmr.msra.gmra.mrb[4].mxu0 %vm710_vm1, %v833_v27 }
 0x116   : > { %1458 = vmatprep.mubr.msk.bf16.mxu0 %vm1651_vm0, %v1650_v0  ;;  %1457 = vmatpush3.bf16.msra.mxu0 %v977_v49  ;;  %v1400_v4 = vld [vmem:[%s2045_s22] ss:$0 sm:$0xff] (!%p1399_p1) }
 0x118   : > { %v1402_v19 = vld [vmem:[%s2047_s20] ss:$0 sm:$0xff] (!%p1399_p1) }
 0x1e8   : > { %v895_v29 = vpop.f32.mrb[4].mxu0 }
 0x1e9   : > { %v896_v30 = vadd.f32 %v1390_v28, %v895_v29  ;;  %v1448_v31 = vpop.f32.mrb[5].mxu0 }
 0x1ea   : > { %v898_v32 = vpop.f32.mrb[6].mxu0 }
 0x1eb   : > { %v907_v33 = vpack.c.bf16 %v896_v30, %v896_v30  ;;  %v1449_v34 = vpop.f32.mrb[7].mxu0 }
 0x1ed   : > { %1453 = vmatmul.mubr.msk.bf16.vlgmr.msra.gmra.mrb[4].mxu1 %vm908_vm3, %v907_v33 }
 0x1ee   : > { %1464 = vmatprep.mubr.msk.bf16.mxu1 %vm1651_vm0, %v1650_v0  ;;  %1463 = vmatpush3.bf16.msra.mxu1 %v1026_v51 }
 0x2c0   : > { %v949_v36 = vpop.f32.mrb[4].mxu1 }
 0x2c1   : > { %v955_v37 = vmul.f32 0.35355338, %v949_v36  ;;  %v1454_v38 = vpop.f32.mrb[5].mxu1 }
 0x2c2   : > { %v952_v39 = vpop.f32.mrb[6].mxu1 }
 0x2c3   : > { %v1455_v40 = vpop.f32.mrb[7].mxu1  ;;  %v958_v41 = vsel %vm957_vm4, -1e+09, %v955_v37 }
 0x2c4   : > { %v959_v42 = vsel %vm908_vm3, %v958_v41, -inf }
 0x2c5   : > { %960 = vmax.xlane.f32.xlu0 %v959_v42 }
 0x352   : > { %v961_v43 = vpop.xlane.xlu0 %960 }
 0x353   : > { %v962_v44 = vsub.f32 %v958_v41, %v961_v43 }
 0x355   : > { %v963_v45 = vmul.f32 1.442695, %v962_v44 }
 0x357   : > { %1548 = vpow2.f32 %v963_v45 }
 0x361   : > { %v1549_v46 = vpop.eup %1548 }
 0x362   : > { %v965_v47 = vsel %vm908_vm3, %v1549_v46, 0.0 }
 0x363   : > { %966 = vadd.xlane.f32.xlu0 %v965_v47 }
 0x3f0   : > { %v967_v52 = vpop.xlane.xlu0 %966 }
 0x3f1   : > { %1550 = vrcp.f32 %v967_v52 }
 0x3fb   : > { %v1551_v53 = vpop.eup %1550 }
 0x3fc   : > { %v969_v54 = vmul.f32 %v1551_v53, %v1549_v46 }
 0x3fe   : > { %970 = vst.msk [vmem:[%s626_s25] sm:$0xff] %vm908_vm3, %v969_v54  ;;  %v971_v55 = vpack.c.bf16 %v969_v54, %v969_v54 }
 0x400   : > { %1459 = vmatmul.mubr.msk.bf16.vlgmr.msra.gmra.mrb[8].mxu0 %vm908_vm3, %v971_v55 }
 0x4d3   : > { %v1013_v56 = vpop.f32.mrb[8].mxu0 }
 0x4d4   : > { %v1020_v57 = vpack.c.bf16 %v1013_v56, %v1013_v56  ;;  %v1460_v58 = vpop.f32.mrb[9].mxu0 }
 0x4d5   : > { %v1016_v59 = vpop.f32.mrb[10].mxu0 }
 0x4d6   : > { %v1461_v60 = vpop.f32.mrb[11].mxu0  ;;  %1465 = vmatmul.mubr.msk.bf16.vlgmr.msra.gmra.mrb[8].mxu1 %vm908_vm3, %v1020_v57 }
 0x5a6   : > { %1073 = sbr.rel (%p1399_p1) target bundleno = 1778 (0x6f2), region = 84 }
 0x5a9   : > { %v1062_v62 = vpop.f32.mrb[8].mxu1 }
 0x5aa   : > { %v1068_v63 = vadd.f32 %v1062_v62, %v1019_v61  ;;  %v1466_v0 = vpop.f32.mrb[9].mxu1 }
 0x5ab   : > { %v1065_v1 = vpop.f32.mrb[10].mxu1 }
 0x5ac   : > { %1069 = vst.msk [vmem:[#allocation4] sm:$0xff] %vm710_vm1, %v1068_v63  ;;  %v1467_v2 = vpop.f32.mrb[11].mxu1 }
 0x5b3   : > { %v1074_v3 = vld [vmem:[#allocation4] sm:$0xff] }
 0x5b4   : > { %v1075_v5 = vadd.f32 %v1074_v3, %v1889_v24 }
 0x5b6   : > { %v1083_v6 = vadd.f32 %v1400_v4, %v1075_v5 }
 0x5b8   : > { %v1086_v7 = vsel %vm710_vm1, %v1083_v6, 0.0 }
 0x5b9   : > { %1087 = vadd.xlane.f32.xlu0 %v1086_v7 }
 0x646   : > { %v1088_v8 = vpop.xlane.xlu0 %1087 }
 0x647   : > { %v1090_v9 = vmul.f32 0.03125, %v1088_v8 }
 0x649   : > { %v1091_v10 = vsub.f32 %v1083_v6, %v1090_v9 }
 0x64b   : > { %v1092_v11 = vmul.f32 %v1091_v10, %v1091_v10 }
 0x64d   : > { %v1093_v12 = vsel %vm710_vm1, %v1092_v11, 0.0 }
 0x64e   : > { %1094 = vadd.xlane.f32.xlu0 %v1093_v12 }
 0x6db   : > { %v1095_v13 = vpop.xlane.xlu0 %1094 }
 0x6dc   : > { %v1096_v14 = vmul.f32 0.03125, %v1095_v13 }
 0x6de   : > { %v1097_v15 = vadd.f32 1e-05, %v1096_v14 }
 0x6e0   : > { %1552 = vrsqrt.f32 %v1097_v15 }
 0x6ea   : > { %v1553_v16 = vpop.eup %1552 }
 0x6eb   : > { %v1099_v18 = vmul.f32 %v1553_v16, %v1091_v10 }
 0x6ed   : > { %v1106_v20 = vmul.f32 %v1401_v17, %v1099_v18 }
 0x6ef   : > { %v1113_v21 = vadd.f32 %v1402_v19, %v1106_v20 }
 0x6f1   : > { %1114 = vst.msk [vmem:[%s679_s28] sm:$0xff] %vm710_vm1, %v1113_v21 }
 0x6f2 PF: > { %s2048_s15 = sld [smem:[#allocation11_spill]]  ;;  %s1142_s14 = sshll.u32 %s626_s25, 4  ;;  %s1946_s14 = int_to_ptr.vmem [resolvable:$true] %s1142_s14 }
 0x6f3   : > { %s2049_s12 = sld [smem:[#allocation9_spill]]  ;;  %s2051_s11 = sld [smem:[#allocation23_spill]] }
 0x6f4   : > { %s1554_s10 = scalar_lea.vmem %s1946_s14, 128 }
 0x6f5   : > { %p1555_p2 = scmp.ne.s32.totalorder %s1946_s14, %s1554_s10 }
 0x6f7   : > { %p1556_p4 = pnand %p1555_p2, %p1780_p3 }
 0x6f8   : > { %s1404_s30 = sshll.u32 %s2048_s15, 2 }
 0x6f9   : > { %s1138_s24 = sadd.s32 %s1632_s16, %s1404_s30  ;;  %s2052_s28 = sand.u32 1, %s2049_s12  }
 0x6fa   : > { %s1405_s22 = sshll.u32 %s1138_s24, 7  ;;  %s1123_s26 = scalar_lea.sflag [#allocation6], %s2052_s28 }
 0x6fb   : > { %s1140_s21 = scalar_lea.hbm %s2051_s11, %s1405_s22  ;;  %p1557_p5 = pneg %p1556_p4 }
 0x6fc   : > { %s1653_s16 = smov [#allocation5]  }
 0x6fd   : > { %s1558_s18 = sshll.u32 %s1653_s16, 4  ;;  %s1559_s18 = int_to_ptr.vmem [resolvable:$false] %s1558_s18 }
 0x6fe   : > { %s1560_s25 = scalar_lea.vmem %s1559_s18, 256  ;;  %p1561_p6 = scmp.lt.s32.totalorder %s1946_s14, %s1559_s18 }
 0x6ff   : > { %p1562_p7 = scmp.lt.s32.totalorder %s1560_s25, %s1554_s10 }
 0x701   : > { %p1563_p9 = por %p1562_p7, %p1561_p6 }
 0x703   : > { %p1564_p10 = pnand %p1563_p9, %p1557_p5 }
 0x705   : > { %1567 = shalt.err (!%p1564_p10)
}
 0x706   : > { %s1568_s20 = scalar_lea.hbm %s1140_s21, 128  ;;  %s1572_s15 = scalar_lea.hbm %s2051_s11, 1024 }
 0x707   : > { %p1569_p11 = scmp.ne.s32.totalorder %s1140_s21, %s1568_s20  ;;  %p1573_p0 = scmp.lt.u32.totalorder %s1140_s21, %s2051_s11 }
 0x708   : > { %p1574_p1 = scmp.lt.u32.totalorder %s1572_s15, %s1568_s20  ;;  %p1576_p4 = scmp.lt.u32.totalorder %s1568_s20, %s1140_s21 }
 0x709   : > { %p1570_p12 = pnand %p1569_p11, %p1780_p3 }
 0x70a   : > { %p1575_p2 = por %p1574_p1, %p1573_p0 }
 0x70b   : > { %p1571_p13 = pneg %p1570_p12 }
 0x70c   : > { %p1577_p6 = por %p1576_p4, %p1575_p2 }
 0x70e   : > { %p1578_p5 = pnand %p1577_p6, %p1571_p13 }
 0x710   : > { %1581 = shalt.err (!%p1578_p5)
}
 0x711   : > { %1468 = dma.vmem_to_hbm [thread:$0]  (%p1780_p3), %s1946_s14, 128, %s1140_s21, %s1123_s26  }
 0x712 PF: > { %s2053_s24 = sld [smem:[#allocation14_spill]]  ;;  %s2054_s22 = sld [smem:[#allocation8_spill]] }
 0x718   : > { %p1474_p7 = scmp.ge.s32.totalorder %s2053_s24, 2  ;;  %s1164_s23 = sand.u32 1, %s2054_s22  }
 0x719   : > { %s1165_s28 = scalar_lea.sflag [#allocation6], %s1164_s23 }
 0x71a   : > { %p1471_p9 = pnand %p1474_p7, %p1789_p8 }
 0x71c   : > { %1615 = dma.done.wait (!%p1471_p9), %s1165_s28, 128  }
 0x71d   : > { %1617 = vsyncadd (!%p1471_p9), %s1165_s28, 4294967168  ;;  %s28_s20 = sadd.s32 1, %s2053_s24   ;;  %s2056_s29 = sld [smem:[#allocation9_spill]] }
 0x71e   : > { %p25_p10 = scmp.ge.s32.totalorder %s28_s20, 10   ;;  %s2057_s30 = sld [smem:[#allocation10_spill]] }
 0x71f   : > { %s2058_s15 = sld [smem:[#allocation19_spill]]  ;;  %s2059_s16 = sld [smem:[#allocation12_spill]] }
 0x720   : > { %s2060_s17 = sld [smem:[#allocation13_spill]]  ;;  %s2061_s18 = sld [smem:[#allocation15_spill]] }
 0x721   : > { %s2062_s19 = sld [smem:[#allocation17_spill]]  ;;  %27 = sbr.rel (!%p25_p10) target bundleno = 10 (0xa), region = 162 }
 0x728   :  { %1170 = vsyncpa [#allocation6], 1 }
 0x729   :  { %1172 = vsyncpa [#allocation6 + $0x1], 1 }

</bundles_post_ra>
